<compile_context>
chip_gen: v7x
topology: tpu7x:2x2x1
jax: 0.10.0
libtpu: 0.0.40
codegen_flags: <defaults>
</compile_context>

<pallas_src>
import math
import functools

import jax
import jax.numpy as jnp
from jax.experimental import pallas as pl
from jax.experimental.pallas import tpu as pltpu

# ----------------------------- config ---------------------------------------
D_MODEL = 32
HEADS = 4
D_FF = 64
SEQ = 8
BATCH = 2
EPS = 1e-6
NEG_INF = -1e18


# ----------------------------- kernel ---------------------------------------
def _layer_norm(v, g, b):
    mu = jnp.mean(v, axis=-1, keepdims=True)
    var = jnp.mean((v - mu) ** 2, axis=-1, keepdims=True)
    return (v - mu) * jax.lax.rsqrt(var + EPS) * g + b


def decoder_layer_kernel(
    x_ref, pad_ref,
    ln1_g_ref, ln1_b_ref,
    wq_ref, bq_ref, wkv_t_ref, bkv_t_ref, wo_ref, bo_ref,
    ffln_g_ref, ffln_b_ref, w1_ref, b1_ref, w2_ref, b2_ref,
    out_ref, attn_ref,
    *, heads):
    bpg, T, D = x_ref.shape            # batch-elements per grid step
    dh = D // heads
    scale = 1.0 / math.sqrt(dh)
    N = bpg * T

    # ---- shared LN1 + Q projection over all rows of this step -------------
    x2 = x_ref[...].reshape(N, D)                              # (N, D)
    x_ln = _layer_norm(x2, ln1_g_ref[...], ln1_b_ref[...])

    q2 = (jnp.dot(x_ln, wq_ref[...], preferred_element_type=jnp.float32)
          + bq_ref[...]) * scale                               # (N, D), pre-scaled

    wkv_t = wkv_t_ref[...]                                     # (2D, D) = [Wk^T ; Wv^T]
    bkv_t = bkv_t_ref[...]                                     # (2D, 1)
    wo = wo_ref[...]                                           # (D, D)
    pad_all = pad_ref[...]                                     # (bpg, 1, T) int32

    # causal mask built in-kernel (no (B,T,T) mask DMA)
    row_ids = jax.lax.broadcasted_iota(jnp.int32, (T, T), 0)
    col_ids = jax.lax.broadcasted_iota(jnp.int32, (T, T), 1)
    future = col_ids > row_ids                                 # (T, T) bool

    scores = []
    v_ts = []
    for b in range(bpg):
        x_ln_b = x_ln[b * T:(b + 1) * T, :]                    # sublane slice (free)
        # fused K/V projection, produced pre-transposed: (2D, T)
        kv_t = jax.lax.dot_general(
            wkv_t, x_ln_b, (((1,), (1,)), ((), ())),
            preferred_element_type=jnp.float32) + bkv_t
        k_t = kv_t[:D, :]                                      # (D, T)  = K^T
        v_ts.append(kv_t[D:, :])                               # (D, T)  = V^T
        dec_mask = jnp.logical_or(pad_all[b] > 0, future)      # (T, T)

        for h in range(heads):
            qh = q2[b * T:(b + 1) * T, h * dh:(h + 1) * dh]    # (T, dh)
            kh_t = k_t[h * dh:(h + 1) * dh, :]                 # (dh, T) sublane slice
            s = jnp.dot(qh, kh_t, preferred_element_type=jnp.float32)  # (T, T)
            scores.append(jnp.where(dec_mask, NEG_INF, s))

    # ---- batched masked softmax over all (batch, head) tiles ---------------
    s_all = jnp.stack(scores, axis=0)                          # (bpg*H, T, T)
    m = jnp.max(s_all, axis=-1, keepdims=True)
    e = jnp.exp(s_all - m)
    denom = jnp.sum(e, axis=-1, keepdims=True)
    inv = pl.reciprocal(denom, approx=True)                    # EUP slot
    inv = inv * (2.0 - denom * inv)                            # one Newton step -> ~f32 exact
    p = e * inv                                                # (bpg*H, T, T)

    attn_ref[...] = p.reshape(bpg, heads, T, T)                # single store

    # ---- context + Wo folded per head (no concatenate) ---------------------
    outs = []
    for b in range(bpg):
        acc = jnp.zeros((T, D), jnp.float32)
        v_t = v_ts[b]
        for h in range(heads):
            ph = p[b * heads + h]                              # (T, T)
            vh_t = v_t[h * dh:(h + 1) * dh, :]                 # (dh, T)
            ch = jax.lax.dot_general(                          # (T, dh) = P @ V
                ph, vh_t, (((1,), (1,)), ((), ())),
                preferred_element_type=jnp.float32)
            acc = acc + jnp.dot(ch, wo[h * dh:(h + 1) * dh, :],
                                preferred_element_type=jnp.float32)
        outs.append(acc)

    self_out = jnp.concatenate(outs, axis=0) + bo_ref[...]     # (N, D)
    query = self_out + x2                                      # residual (dropout = id)

    # ---- PositionwiseFeedForward: w2(relu(w1(LN(q)))) + q -------------------
    q_ln = _layer_norm(query, ffln_g_ref[...], ffln_b_ref[...])
    inter = jnp.maximum(
        jnp.dot(q_ln, w1_ref[...], preferred_element_type=jnp.float32)
        + b1_ref[...], 0.0)
    ff = jnp.dot(inter, w2_ref[...], preferred_element_type=jnp.float32) + b2_ref[...]
    out_ref[...] = (ff + query).reshape(bpg, T, D)


# ----------------------------- wrapper ---------------------------------------
def transformer_decoder_layer(x, tgt_pad_mask, params, *, heads=HEADS,
                              batch_per_step=None):
    """x: (B, T, D) f32 ; tgt_pad_mask: (B, 1, T) bool (True = pad).

    batch_per_step:
      None / B  -> single grid step (best for single-TC v5e / v6e)
      B // 2    -> 2-wide "parallel" grid axis (shards across v7x's 2 TCs)
    """
    B, T, D = x.shape
    H = heads
    if batch_per_step is None:
        batch_per_step = B
    assert B % batch_per_step == 0
    bpg = batch_per_step
    steps = B // bpg

    pad = tgt_pad_mask.astype(jnp.int32)                                 # (B, 1, T)
    # fused, pre-transposed K/V weights: (2D, D) / (2D, 1)
    wkv_t = jnp.concatenate([params["wk"], params["wv"]], axis=1).T
    bkv_t = jnp.concatenate([params["bk"], params["bv"]], axis=1).T

    def full_spec(*shape):
        zeros = (0,) * len(shape)
        return pl.BlockSpec(shape, lambda i: zeros)

    def batched_spec(*shape):
        zeros = (0,) * len(shape)
        return pl.BlockSpec((bpg,) + shape, lambda i: (i,) + zeros)

    D_FF_ = params["w1"].shape[1]

    in_specs = [
        batched_spec(T, D),                 # x
        batched_spec(1, T),                 # pad mask
        full_spec(1, D), full_spec(1, D),   # ln1 gamma / beta
        full_spec(D, D), full_spec(1, D),   # Wq, bq
        full_spec(2 * D, D),                # [Wk;Wv]^T
        full_spec(2 * D, 1),                # [bk;bv]^T
        full_spec(D, D), full_spec(1, D),   # Wo, bo
        full_spec(1, D), full_spec(1, D),   # ffn LN gamma / beta
        full_spec(D, D_FF_), full_spec(1, D_FF_),   # W1, b1
        full_spec(D_FF_, D), full_spec(1, D),       # W2, b2
    ]
    out_specs = [
        batched_spec(T, D),                 # output
        batched_spec(H, T, T),              # attention probabilities
    ]
    out_shape = (
        jax.ShapeDtypeStruct((B, T, D), jnp.float32),
        jax.ShapeDtypeStruct((B, H, T, T), jnp.float32),
    )

    output, attns = pl.pallas_call(
        functools.partial(decoder_layer_kernel, heads=H),
        out_shape=out_shape,
        grid_spec=pltpu.PrefetchScalarGridSpec(
            num_scalar_prefetch=0,
            grid=(steps,),
            in_specs=in_specs,
            out_specs=out_specs,
        ),
        compiler_params=pltpu.CompilerParams(
            dimension_semantics=("parallel",)),
    )(
        x, pad,
        params["ln1_g"], params["ln1_b"],
        params["wq"], params["bq"], wkv_t, bkv_t,
        params["wo"], params["bo"],
        params["ffln_g"], params["ffln_b"],
        params["w1"], params["b1"], params["w2"], params["b2"],
    )

    # forward() semantics: top_attn = attns[:, 0, :, :]; attn_align = None
    top_attn = attns[:, 0, :, :]
    return output, top_attn, None, attns


# ----------------------------- pure-JAX reference -----------------------------
def reference(x, tgt_pad_mask, params):
    B, T, D = x.shape
    H, dh = HEADS, D // HEADS
    future = jnp.triu(jnp.ones((T, T), jnp.int32), 1)[None]
    dec_mask = ((tgt_pad_mask.astype(jnp.int32) + future) > 0)        # (B,T,T)

    def ln(v, g, b):
        mu = v.mean(-1, keepdims=True)
        var = ((v - mu) ** 2).mean(-1, keepdims=True)
        return (v - mu) / jnp.sqrt(var + EPS) * g + b

    x_ln = ln(x, params["ln1_g"][0], params["ln1_b"][0])
    q = x_ln @ params["wq"] + params["bq"][0]
    k = x_ln @ params["wk"] + params["bk"][0]
    v = x_ln @ params["wv"] + params["bv"][0]
    rs = lambda a: a.reshape(B, T, H, dh).transpose(0, 2, 1, 3)
    qh, kh, vh = rs(q) / math.sqrt(dh), rs(k), rs(v)
    scores = jnp.einsum("bhqd,bhkd->bhqk", qh, kh)
    scores = jnp.where(dec_mask[:, None], NEG_INF, scores)
    attn = jax.nn.softmax(scores, axis=-1)
    ctx = jnp.einsum("bhqk,bhkd->bhqd", attn, vh)
    ctx = ctx.transpose(0, 2, 1, 3).reshape(B, T, D)
    self_out = ctx @ params["wo"] + params["bo"][0]
    query = self_out + x
    q_ln = ln(query, params["ffln_g"][0], params["ffln_b"][0])
    inter = jnp.maximum(q_ln @ params["w1"] + params["b1"][0], 0.0)
    out = inter @ params["w2"] + params["b2"][0] + query
    return out, attn[:, 0], attn


# ----------------------------- main ------------------------------------------
def make_params(key):
    ks = jax.random.split(key, 12)
    n = lambda k, *s: (jax.random.normal(k, s, jnp.float32) * 0.1)
    return dict(
        ln1_g=jnp.ones((1, D_MODEL), jnp.float32) + n(ks[0], 1, D_MODEL),
        ln1_b=n(ks[1], 1, D_MODEL),
        wq=n(ks[2], D_MODEL, D_MODEL), bq=n(ks[3], 1, D_MODEL),
        wk=n(ks[4], D_MODEL, D_MODEL), bk=n(ks[5], 1, D_MODEL),
        wv=n(ks[6], D_MODEL, D_MODEL), bv=n(ks[7], 1, D_MODEL),
        wo=n(ks[8], D_MODEL, D_MODEL), bo=jnp.zeros((1, D_MODEL), jnp.float32),
        ffln_g=jnp.ones((1, D_MODEL), jnp.float32),
        ffln_b=jnp.zeros((1, D_MODEL), jnp.float32),
        w1=n(ks[9], D_MODEL, D_FF), b1=n(ks[10], 1, D_FF),
        w2=n(ks[11], D_FF, D_MODEL), b2=jnp.zeros((1, D_MODEL), jnp.float32),
    )


if __name__ == "__main__":
    key = jax.random.PRNGKey(0)
    kx, kp = jax.random.split(key)
    x = jax.random.normal(kx, (BATCH, SEQ, D_MODEL), jnp.float32)
    # tgt_pad_mask (B, 1, T): pad the last two positions of batch element 1
    tgt_pad_mask = jnp.zeros((BATCH, 1, SEQ), jnp.bool_)
    tgt_pad_mask = tgt_pad_mask.at[1, 0, SEQ - 2:].set(True)

    params = make_params(kp)
    ref_out, ref_top, ref_attns = reference(x, tgt_pad_mask, params)

    # exercise both grid configurations:
    #   batch_per_step=BATCH  -> collapsed grid (v5e / v6e)
    #   batch_per_step=1      -> 2-wide parallel grid (v7x, 2 TensorCores)
    for bps in (BATCH, 1):
        output, top_attn, attn_align, attns = transformer_decoder_layer(
            x, tgt_pad_mask, params, batch_per_step=bps)
        jax.block_until_ready((output, attns))

        assert output.shape == (BATCH, SEQ, D_MODEL)
        assert top_attn.shape == (BATCH, SEQ, SEQ)
        assert attn_align is None
        assert jnp.allclose(output, ref_out, atol=2e-4, rtol=2e-4), bps
        assert jnp.allclose(attns, ref_attns, atol=5e-5, rtol=1e-4), bps
        assert jnp.allclose(top_attn, ref_top, atol=5e-5, rtol=1e-4), bps

    print("KERNEL_OK")
</pallas_src>

<mosaic_0001>
module attributes {stable_mosaic.version = 11 : i64} {
  func.func @decoder_layer_kernel(%arg0: i32, %arg1: memref<2x8x32xf32, #tpu.memory_space<vmem>>, %arg2: memref<2x1x8xi32, #tpu.memory_space<vmem>>, %arg3: memref<1x32xf32, #tpu.memory_space<vmem>>, %arg4: memref<1x32xf32, #tpu.memory_space<vmem>>, %arg5: memref<32x32xf32, #tpu.memory_space<vmem>>, %arg6: memref<1x32xf32, #tpu.memory_space<vmem>>, %arg7: memref<64x32xf32, #tpu.memory_space<vmem>>, %arg8: memref<64x1xf32, #tpu.memory_space<vmem>>, %arg9: memref<32x32xf32, #tpu.memory_space<vmem>>, %arg10: memref<1x32xf32, #tpu.memory_space<vmem>>, %arg11: memref<1x32xf32, #tpu.memory_space<vmem>>, %arg12: memref<1x32xf32, #tpu.memory_space<vmem>>, %arg13: memref<32x64xf32, #tpu.memory_space<vmem>>, %arg14: memref<1x64xf32, #tpu.memory_space<vmem>>, %arg15: memref<64x32xf32, #tpu.memory_space<vmem>>, %arg16: memref<1x32xf32, #tpu.memory_space<vmem>>, %arg17: memref<2x8x32xf32, #tpu.memory_space<vmem>>, %arg18: memref<2x4x8x8xf32, #tpu.memory_space<vmem>>) attributes {dimension_semantics = [#tpu.dimension_semantics<parallel>], iteration_bounds = array<i64: 1>, scalar_prefetch = 0 : i64, scratch_operands = 0 : i64, tpu.core_type = #tpu.core_type<tc>, window_params = [{transform_indices = @transform_0, window_bounds = array<i64: 2, 8, 32>}, {transform_indices = @transform_1, window_bounds = array<i64: 2, 1, 8>}, {pipeline_mode = #tpu.pipeline_mode<synchronous>, transform_indices = @transform_2, window_bounds = array<i64: 1, 32>}, {pipeline_mode = #tpu.pipeline_mode<synchronous>, transform_indices = @transform_3, window_bounds = array<i64: 1, 32>}, {pipeline_mode = #tpu.pipeline_mode<synchronous>, transform_indices = @transform_4, window_bounds = array<i64: 32, 32>}, {pipeline_mode = #tpu.pipeline_mode<synchronous>, transform_indices = @transform_5, window_bounds = array<i64: 1, 32>}, {pipeline_mode = #tpu.pipeline_mode<synchronous>, transform_indices = @transform_6, window_bounds = array<i64: 64, 32>}, {pipeline_mode = #tpu.pipeline_mode<synchronous>, transform_indices = @transform_7, window_bounds = array<i64: 64, 1>}, {pipeline_mode = #tpu.pipeline_mode<synchronous>, transform_indices = @transform_8, window_bounds = array<i64: 32, 32>}, {pipeline_mode = #tpu.pipeline_mode<synchronous>, transform_indices = @transform_9, window_bounds = array<i64: 1, 32>}, {pipeline_mode = #tpu.pipeline_mode<synchronous>, transform_indices = @transform_10, window_bounds = array<i64: 1, 32>}, {pipeline_mode = #tpu.pipeline_mode<synchronous>, transform_indices = @transform_11, window_bounds = array<i64: 1, 32>}, {pipeline_mode = #tpu.pipeline_mode<synchronous>, transform_indices = @transform_12, window_bounds = array<i64: 32, 64>}, {pipeline_mode = #tpu.pipeline_mode<synchronous>, transform_indices = @transform_13, window_bounds = array<i64: 1, 64>}, {pipeline_mode = #tpu.pipeline_mode<synchronous>, transform_indices = @transform_14, window_bounds = array<i64: 64, 32>}, {pipeline_mode = #tpu.pipeline_mode<synchronous>, transform_indices = @transform_15, window_bounds = array<i64: 1, 32>}, {transform_indices = @transform_16, window_bounds = array<i64: 2, 8, 32>}, {transform_indices = @transform_17, window_bounds = array<i64: 2, 4, 8, 8>}]} {
    %c0 = arith.constant 0 : index
    %c0_0 = arith.constant 0 : index
    %c0_1 = arith.constant 0 : index
    %0 = vector.load %arg1[%c0, %c0_0, %c0_1] : memref<2x8x32xf32, #tpu.memory_space<vmem>>, vector<2x8x32xf32>
    %1 = vector.shape_cast %0 : vector<2x8x32xf32> to vector<16x32xf32>
    %c0_2 = arith.constant 0 : index
    %c0_3 = arith.constant 0 : index
    %2 = vector.load %arg3[%c0_2, %c0_3] : memref<1x32xf32, #tpu.memory_space<vmem>>, vector<1x32xf32>
    %c0_4 = arith.constant 0 : index
    %c0_5 = arith.constant 0 : index
    %3 = vector.load %arg4[%c0_4, %c0_5] : memref<1x32xf32, #tpu.memory_space<vmem>>, vector<1x32xf32>
    %cst = arith.constant dense<0.000000e+00> : vector<16xf32>
    %4 = vector.multi_reduction <add>, %1, %cst [1] : vector<16x32xf32> to vector<16xf32>
    %5 = vector.shape_cast %4 : vector<16xf32> to vector<16x1xf32>
    %cst_6 = arith.constant 3.200000e+01 : f32
    %6 = vector.broadcast %cst_6 : f32 to vector<16x1xf32>
    %7 = arith.divf %5, %6 : vector<16x1xf32>
    %8 = vector.broadcast %7 : vector<16x1xf32> to vector<16x32xf32>
    %9 = arith.subf %1, %8 : vector<16x32xf32>
    %10 = arith.mulf %9, %9 : vector<16x32xf32>
    %cst_7 = arith.constant dense<0.000000e+00> : vector<16xf32>
    %11 = vector.multi_reduction <add>, %10, %cst_7 [1] : vector<16x32xf32> to vector<16xf32>
    %12 = vector.shape_cast %11 : vector<16xf32> to vector<16x1xf32>
    %cst_8 = arith.constant 3.200000e+01 : f32
    %13 = vector.broadcast %cst_8 : f32 to vector<16x1xf32>
    %14 = arith.divf %12, %13 : vector<16x1xf32>
    %15 = vector.broadcast %7 : vector<16x1xf32> to vector<16x32xf32>
    %16 = arith.subf %1, %15 : vector<16x32xf32>
    %cst_9 = arith.constant 9.99999997E-7 : f32
    %17 = vector.broadcast %cst_9 : f32 to vector<16x1xf32>
    %18 = arith.addf %14, %17 : vector<16x1xf32>
    %19 = math.rsqrt %18 : vector<16x1xf32>
    %20 = vector.broadcast %19 : vector<16x1xf32> to vector<16x32xf32>
    %21 = arith.mulf %16, %20 : vector<16x32xf32>
    %22 = vector.broadcast %2 : vector<1x32xf32> to vector<16x32xf32>
    %23 = arith.mulf %21, %22 : vector<16x32xf32>
    %24 = vector.broadcast %3 : vector<1x32xf32> to vector<16x32xf32>
    %25 = arith.addf %23, %24 : vector<16x32xf32>
    %c0_10 = arith.constant 0 : index
    %c0_11 = arith.constant 0 : index
    %26 = vector.load %arg5[%c0_10, %c0_11] : memref<32x32xf32, #tpu.memory_space<vmem>>, vector<32x32xf32>
    %cst_12 = arith.constant dense<0.000000e+00> : vector<16x32xf32>
    %27 = tpu.matmul %25, %26, %cst_12 {dimension_numbers = #tpu.dot_dimension_numbers<[1], [0], [0], [1], [0, 0, 1, 1], [], []>} : vector<16x32xf32>, vector<32x32xf32>, vector<16x32xf32> -> vector<16x32xf32>
    %c0_13 = arith.constant 0 : index
    %c0_14 = arith.constant 0 : index
    %28 = vector.load %arg6[%c0_13, %c0_14] : memref<1x32xf32, #tpu.memory_space<vmem>>, vector<1x32xf32>
    %29 = vector.broadcast %28 : vector<1x32xf32> to vector<16x32xf32>
    %30 = arith.addf %27, %29 : vector<16x32xf32>
    %cst_15 = arith.constant 0.353553385 : f32
    %31 = vector.broadcast %cst_15 : f32 to vector<16x32xf32>
    %32 = arith.mulf %30, %31 : vector<16x32xf32>
    %c0_16 = arith.constant 0 : index
    %c0_17 = arith.constant 0 : index
    %33 = vector.load %arg7[%c0_16, %c0_17] : memref<64x32xf32, #tpu.memory_space<vmem>>, vector<64x32xf32>
    %c0_18 = arith.constant 0 : index
    %c0_19 = arith.constant 0 : index
    %34 = vector.load %arg8[%c0_18, %c0_19] : memref<64x1xf32, #tpu.memory_space<vmem>>, vector<64x1xf32>
    %c0_20 = arith.constant 0 : index
    %c0_21 = arith.constant 0 : index
    %35 = vector.load %arg9[%c0_20, %c0_21] : memref<32x32xf32, #tpu.memory_space<vmem>>, vector<32x32xf32>
    %c0_22 = arith.constant 0 : index
    %c0_23 = arith.constant 0 : index
    %c0_24 = arith.constant 0 : index
    %36 = vector.load %arg2[%c0_22, %c0_23, %c0_24] : memref<2x1x8xi32, #tpu.memory_space<vmem>>, vector<2x1x8xi32>
    %37 = tpu.iota {dimensions = array<i32: 0>} : vector<8x8xi32>
    %38 = tpu.iota {dimensions = array<i32: 1>} : vector<8x8xi32>
    %39 = arith.cmpi sgt, %38, %37 : vector<8x8xi32>
    %40 = vector.extract_strided_slice %25 {offsets = [0, 0], sizes = [8, 32], strides = [1, 1]} : vector<16x32xf32> to vector<8x32xf32>
    %cst_25 = arith.constant dense<0.000000e+00> : vector<64x8xf32>
    %41 = tpu.matmul %33, %40, %cst_25 {dimension_numbers = #tpu.dot_dimension_numbers<[1], [1], [0], [0], [0, 0, 1, 0], [], []>} : vector<64x32xf32>, vector<8x32xf32>, vector<64x8xf32> -> vector<64x8xf32>
    %42 = vector.broadcast %34 : vector<64x1xf32> to vector<64x8xf32>
    %43 = arith.addf %41, %42 : vector<64x8xf32>
    %44 = vector.extract_strided_slice %43 {offsets = [0, 0], sizes = [32, 8], strides = [1, 1]} : vector<64x8xf32> to vector<32x8xf32>
    %45 = vector.extract_strided_slice %43 {offsets = [32, 0], sizes = [32, 8], strides = [1, 1]} : vector<64x8xf32> to vector<32x8xf32>
    %46 = vector.extract_strided_slice %36 {offsets = [0, 0, 0], sizes = [1, 1, 8], strides = [1, 1, 1]} : vector<2x1x8xi32> to vector<1x1x8xi32>
    %47 = vector.shape_cast %46 : vector<1x1x8xi32> to vector<1x8xi32>
    %c0_i32 = arith.constant 0 : i32
    %48 = vector.broadcast %c0_i32 : i32 to vector<1x8xi32>
    %49 = arith.cmpi sgt, %47, %48 : vector<1x8xi32>
    %50 = vector.broadcast %49 : vector<1x8xi1> to vector<8x8xi1>
    %51 = arith.ori %50, %39 : vector<8x8xi1>
    %52 = vector.extract_strided_slice %32 {offsets = [0, 0], sizes = [8, 8], strides = [1, 1]} : vector<16x32xf32> to vector<8x8xf32>
    %53 = vector.extract_strided_slice %44 {offsets = [0, 0], sizes = [8, 8], strides = [1, 1]} : vector<32x8xf32> to vector<8x8xf32>
    %cst_26 = arith.constant dense<0.000000e+00> : vector<8x8xf32>
    %54 = tpu.matmul %52, %53, %cst_26 {dimension_numbers = #tpu.dot_dimension_numbers<[1], [0], [0], [1], [0, 0, 1, 1], [], []>} : vector<8x8xf32>, vector<8x8xf32>, vector<8x8xf32> -> vector<8x8xf32>
    %cst_27 = arith.constant -9.99999984E+17 : f32
    %55 = vector.broadcast %cst_27 : f32 to vector<8x8xf32>
    %56 = arith.select %51, %55, %54 : vector<8x8xi1>, vector<8x8xf32>
    %57 = vector.extract_strided_slice %32 {offsets = [0, 8], sizes = [8, 8], strides = [1, 1]} : vector<16x32xf32> to vector<8x8xf32>
    %58 = vector.extract_strided_slice %44 {offsets = [8, 0], sizes = [8, 8], strides = [1, 1]} : vector<32x8xf32> to vector<8x8xf32>
    %cst_28 = arith.constant dense<0.000000e+00> : vector<8x8xf32>
    %59 = tpu.matmul %57, %58, %cst_28 {dimension_numbers = #tpu.dot_dimension_numbers<[1], [0], [0], [1], [0, 0, 1, 1], [], []>} : vector<8x8xf32>, vector<8x8xf32>, vector<8x8xf32> -> vector<8x8xf32>
    %cst_29 = arith.constant -9.99999984E+17 : f32
    %60 = vector.broadcast %cst_29 : f32 to vector<8x8xf32>
    %61 = arith.select %51, %60, %59 : vector<8x8xi1>, vector<8x8xf32>
    %62 = vector.extract_strided_slice %32 {offsets = [0, 16], sizes = [8, 8], strides = [1, 1]} : vector<16x32xf32> to vector<8x8xf32>
    %63 = vector.extract_strided_slice %44 {offsets = [16, 0], sizes = [8, 8], strides = [1, 1]} : vector<32x8xf32> to vector<8x8xf32>
    %cst_30 = arith.constant dense<0.000000e+00> : vector<8x8xf32>
    %64 = tpu.matmul %62, %63, %cst_30 {dimension_numbers = #tpu.dot_dimension_numbers<[1], [0], [0], [1], [0, 0, 1, 1], [], []>} : vector<8x8xf32>, vector<8x8xf32>, vector<8x8xf32> -> vector<8x8xf32>
    %cst_31 = arith.constant -9.99999984E+17 : f32
    %65 = vector.broadcast %cst_31 : f32 to vector<8x8xf32>
    %66 = arith.select %51, %65, %64 : vector<8x8xi1>, vector<8x8xf32>
    %67 = vector.extract_strided_slice %32 {offsets = [0, 24], sizes = [8, 8], strides = [1, 1]} : vector<16x32xf32> to vector<8x8xf32>
    %68 = vector.extract_strided_slice %44 {offsets = [24, 0], sizes = [8, 8], strides = [1, 1]} : vector<32x8xf32> to vector<8x8xf32>
    %cst_32 = arith.constant dense<0.000000e+00> : vector<8x8xf32>
    %69 = tpu.matmul %67, %68, %cst_32 {dimension_numbers = #tpu.dot_dimension_numbers<[1], [0], [0], [1], [0, 0, 1, 1], [], []>} : vector<8x8xf32>, vector<8x8xf32>, vector<8x8xf32> -> vector<8x8xf32>
    %cst_33 = arith.constant -9.99999984E+17 : f32
    %70 = vector.broadcast %cst_33 : f32 to vector<8x8xf32>
    %71 = arith.select %51, %70, %69 : vector<8x8xi1>, vector<8x8xf32>
    %72 = vector.extract_strided_slice %25 {offsets = [8, 0], sizes = [8, 32], strides = [1, 1]} : vector<16x32xf32> to vector<8x32xf32>
    %cst_34 = arith.constant dense<0.000000e+00> : vector<64x8xf32>
    %73 = tpu.matmul %33, %72, %cst_34 {dimension_numbers = #tpu.dot_dimension_numbers<[1], [1], [0], [0], [0, 0, 1, 0], [], []>} : vector<64x32xf32>, vector<8x32xf32>, vector<64x8xf32> -> vector<64x8xf32>
    %74 = vector.broadcast %34 : vector<64x1xf32> to vector<64x8xf32>
    %75 = arith.addf %73, %74 : vector<64x8xf32>
    %76 = vector.extract_strided_slice %75 {offsets = [0, 0], sizes = [32, 8], strides = [1, 1]} : vector<64x8xf32> to vector<32x8xf32>
    %77 = vector.extract_strided_slice %75 {offsets = [32, 0], sizes = [32, 8], strides = [1, 1]} : vector<64x8xf32> to vector<32x8xf32>
    %78 = vector.extract_strided_slice %36 {offsets = [1, 0, 0], sizes = [1, 1, 8], strides = [1, 1, 1]} : vector<2x1x8xi32> to vector<1x1x8xi32>
    %79 = vector.shape_cast %78 : vector<1x1x8xi32> to vector<1x8xi32>
    %c0_i32_35 = arith.constant 0 : i32
    %80 = vector.broadcast %c0_i32_35 : i32 to vector<1x8xi32>
    %81 = arith.cmpi sgt, %79, %80 : vector<1x8xi32>
    %82 = vector.broadcast %81 : vector<1x8xi1> to vector<8x8xi1>
    %83 = arith.ori %82, %39 : vector<8x8xi1>
    %84 = vector.extract_strided_slice %32 {offsets = [8, 0], sizes = [8, 8], strides = [1, 1]} : vector<16x32xf32> to vector<8x8xf32>
    %85 = vector.extract_strided_slice %76 {offsets = [0, 0], sizes = [8, 8], strides = [1, 1]} : vector<32x8xf32> to vector<8x8xf32>
    %cst_36 = arith.constant dense<0.000000e+00> : vector<8x8xf32>
    %86 = tpu.matmul %84, %85, %cst_36 {dimension_numbers = #tpu.dot_dimension_numbers<[1], [0], [0], [1], [0, 0, 1, 1], [], []>} : vector<8x8xf32>, vector<8x8xf32>, vector<8x8xf32> -> vector<8x8xf32>
    %cst_37 = arith.constant -9.99999984E+17 : f32
    %87 = vector.broadcast %cst_37 : f32 to vector<8x8xf32>
    %88 = arith.select %83, %87, %86 : vector<8x8xi1>, vector<8x8xf32>
    %89 = vector.extract_strided_slice %32 {offsets = [8, 8], sizes = [8, 8], strides = [1, 1]} : vector<16x32xf32> to vector<8x8xf32>
    %90 = vector.extract_strided_slice %76 {offsets = [8, 0], sizes = [8, 8], strides = [1, 1]} : vector<32x8xf32> to vector<8x8xf32>
    %cst_38 = arith.constant dense<0.000000e+00> : vector<8x8xf32>
    %91 = tpu.matmul %89, %90, %cst_38 {dimension_numbers = #tpu.dot_dimension_numbers<[1], [0], [0], [1], [0, 0, 1, 1], [], []>} : vector<8x8xf32>, vector<8x8xf32>, vector<8x8xf32> -> vector<8x8xf32>
    %cst_39 = arith.constant -9.99999984E+17 : f32
    %92 = vector.broadcast %cst_39 : f32 to vector<8x8xf32>
    %93 = arith.select %83, %92, %91 : vector<8x8xi1>, vector<8x8xf32>
    %94 = vector.extract_strided_slice %32 {offsets = [8, 16], sizes = [8, 8], strides = [1, 1]} : vector<16x32xf32> to vector<8x8xf32>
    %95 = vector.extract_strided_slice %76 {offsets = [16, 0], sizes = [8, 8], strides = [1, 1]} : vector<32x8xf32> to vector<8x8xf32>
    %cst_40 = arith.constant dense<0.000000e+00> : vector<8x8xf32>
    %96 = tpu.matmul %94, %95, %cst_40 {dimension_numbers = #tpu.dot_dimension_numbers<[1], [0], [0], [1], [0, 0, 1, 1], [], []>} : vector<8x8xf32>, vector<8x8xf32>, vector<8x8xf32> -> vector<8x8xf32>
    %cst_41 = arith.constant -9.99999984E+17 : f32
    %97 = vector.broadcast %cst_41 : f32 to vector<8x8xf32>
    %98 = arith.select %83, %97, %96 : vector<8x8xi1>, vector<8x8xf32>
    %99 = vector.extract_strided_slice %32 {offsets = [8, 24], sizes = [8, 8], strides = [1, 1]} : vector<16x32xf32> to vector<8x8xf32>
    %100 = vector.extract_strided_slice %76 {offsets = [24, 0], sizes = [8, 8], strides = [1, 1]} : vector<32x8xf32> to vector<8x8xf32>
    %cst_42 = arith.constant dense<0.000000e+00> : vector<8x8xf32>
    %101 = tpu.matmul %99, %100, %cst_42 {dimension_numbers = #tpu.dot_dimension_numbers<[1], [0], [0], [1], [0, 0, 1, 1], [], []>} : vector<8x8xf32>, vector<8x8xf32>, vector<8x8xf32> -> vector<8x8xf32>
    %cst_43 = arith.constant -9.99999984E+17 : f32
    %102 = vector.broadcast %cst_43 : f32 to vector<8x8xf32>
    %103 = arith.select %83, %102, %101 : vector<8x8xi1>, vector<8x8xf32>
    %104 = vector.shape_cast %56 : vector<8x8xf32> to vector<1x8x8xf32>
    %105 = vector.shape_cast %61 : vector<8x8xf32> to vector<1x8x8xf32>
    %106 = vector.shape_cast %66 : vector<8x8xf32> to vector<1x8x8xf32>
    %107 = vector.shape_cast %71 : vector<8x8xf32> to vector<1x8x8xf32>
    %108 = vector.shape_cast %88 : vector<8x8xf32> to vector<1x8x8xf32>
    %109 = vector.shape_cast %93 : vector<8x8xf32> to vector<1x8x8xf32>
    %110 = vector.shape_cast %98 : vector<8x8xf32> to vector<1x8x8xf32>
    %111 = vector.shape_cast %103 : vector<8x8xf32> to vector<1x8x8xf32>
    %112 = tpu.concatenate %104, %105, %106, %107, %108, %109, %110, %111 in 0 : vector<1x8x8xf32>, vector<1x8x8xf32>, vector<1x8x8xf32>, vector<1x8x8xf32>, vector<1x8x8xf32>, vector<1x8x8xf32>, vector<1x8x8xf32>, vector<1x8x8xf32> -> vector<8x8x8xf32>
    %cst_44 = arith.constant dense<0xFF800000> : vector<8x8xf32>
    %113 = vector.multi_reduction <maximumf>, %112, %cst_44 [2] : vector<8x8x8xf32> to vector<8x8xf32>
    %114 = vector.shape_cast %113 : vector<8x8xf32> to vector<8x8x1xf32>
    %115 = vector.broadcast %114 : vector<8x8x1xf32> to vector<8x8x8xf32>
    %116 = arith.subf %112, %115 : vector<8x8x8xf32>
    %117 = math.exp %116 : vector<8x8x8xf32>
    %cst_45 = arith.constant dense<0.000000e+00> : vector<8x8xf32>
    %118 = vector.multi_reduction <add>, %117, %cst_45 [2] : vector<8x8x8xf32> to vector<8x8xf32>
    %119 = vector.shape_cast %118 : vector<8x8xf32> to vector<8x8x1xf32>
    %120 = tpu.reciprocal %119 {approx = true} : vector<8x8x1xf32> -> vector<8x8x1xf32>
    %121 = arith.mulf %119, %120 : vector<8x8x1xf32>
    %cst_46 = arith.constant 2.000000e+00 : f32
    %122 = vector.broadcast %cst_46 : f32 to vector<8x8x1xf32>
    %123 = arith.subf %122, %121 : vector<8x8x1xf32>
    %124 = arith.mulf %120, %123 : vector<8x8x1xf32>
    %125 = vector.broadcast %124 : vector<8x8x1xf32> to vector<8x8x8xf32>
    %126 = arith.mulf %117, %125 : vector<8x8x8xf32>
    %127 = vector.shape_cast %126 : vector<8x8x8xf32> to vector<2x4x8x8xf32>
    %c0_47 = arith.constant 0 : index
    %c0_48 = arith.constant 0 : index
    %c0_49 = arith.constant 0 : index
    %c0_50 = arith.constant 0 : index
    %128 = vector.load %arg18[%c0_47, %c0_48, %c0_49, %c0_50] : memref<2x4x8x8xf32, #tpu.memory_space<vmem>>, vector<2x4x8x8xf32>
    tpu.vector_store %arg18[%c0_47, %c0_48, %c0_49, %c0_50], %127 {strides = array<i32>} : memref<2x4x8x8xf32, #tpu.memory_space<vmem>>, vector<2x4x8x8xf32>,
    %cst_51 = arith.constant 0.000000e+00 : f32
    %129 = vector.broadcast %cst_51 : f32 to vector<8x32xf32>
    %130 = vector.extract_strided_slice %126 {offsets = [0, 0, 0], sizes = [1, 8, 8], strides = [1, 1, 1]} : vector<8x8x8xf32> to vector<1x8x8xf32>
    %131 = vector.shape_cast %130 : vector<1x8x8xf32> to vector<8x8xf32>
    %132 = vector.extract_strided_slice %45 {offsets = [0, 0], sizes = [8, 8], strides = [1, 1]} : vector<32x8xf32> to vector<8x8xf32>
    %cst_52 = arith.constant dense<0.000000e+00> : vector<8x8xf32>
    %133 = tpu.matmul %131, %132, %cst_52 {dimension_numbers = #tpu.dot_dimension_numbers<[1], [1], [0], [0], [0, 0, 1, 0], [], []>} : vector<8x8xf32>, vector<8x8xf32>, vector<8x8xf32> -> vector<8x8xf32>
    %134 = vector.extract_strided_slice %35 {offsets = [0, 0], sizes = [8, 32], strides = [1, 1]} : vector<32x32xf32> to vector<8x32xf32>
    %cst_53 = arith.constant dense<0.000000e+00> : vector<8x32xf32>
    %135 = tpu.matmul %133, %134, %cst_53 {dimension_numbers = #tpu.dot_dimension_numbers<[1], [0], [0], [1], [0, 0, 1, 1], [], []>} : vector<8x8xf32>, vector<8x32xf32>, vector<8x32xf32> -> vector<8x32xf32>
    %136 = arith.addf %129, %135 : vector<8x32xf32>
    %137 = vector.extract_strided_slice %126 {offsets = [1, 0, 0], sizes = [1, 8, 8], strides = [1, 1, 1]} : vector<8x8x8xf32> to vector<1x8x8xf32>
    %138 = vector.shape_cast %137 : vector<1x8x8xf32> to vector<8x8xf32>
    %139 = vector.extract_strided_slice %45 {offsets = [8, 0], sizes = [8, 8], strides = [1, 1]} : vector<32x8xf32> to vector<8x8xf32>
    %cst_54 = arith.constant dense<0.000000e+00> : vector<8x8xf32>
    %140 = tpu.matmul %138, %139, %cst_54 {dimension_numbers = #tpu.dot_dimension_numbers<[1], [1], [0], [0], [0, 0, 1, 0], [], []>} : vector<8x8xf32>, vector<8x8xf32>, vector<8x8xf32> -> vector<8x8xf32>
    %141 = vector.extract_strided_slice %35 {offsets = [8, 0], sizes = [8, 32], strides = [1, 1]} : vector<32x32xf32> to vector<8x32xf32>
    %cst_55 = arith.constant dense<0.000000e+00> : vector<8x32xf32>
    %142 = tpu.matmul %140, %141, %cst_55 {dimension_numbers = #tpu.dot_dimension_numbers<[1], [0], [0], [1], [0, 0, 1, 1], [], []>} : vector<8x8xf32>, vector<8x32xf32>, vector<8x32xf32> -> vector<8x32xf32>
    %143 = arith.addf %136, %142 : vector<8x32xf32>
    %144 = vector.extract_strided_slice %126 {offsets = [2, 0, 0], sizes = [1, 8, 8], strides = [1, 1, 1]} : vector<8x8x8xf32> to vector<1x8x8xf32>
    %145 = vector.shape_cast %144 : vector<1x8x8xf32> to vector<8x8xf32>
    %146 = vector.extract_strided_slice %45 {offsets = [16, 0], sizes = [8, 8], strides = [1, 1]} : vector<32x8xf32> to vector<8x8xf32>
    %cst_56 = arith.constant dense<0.000000e+00> : vector<8x8xf32>
    %147 = tpu.matmul %145, %146, %cst_56 {dimension_numbers = #tpu.dot_dimension_numbers<[1], [1], [0], [0], [0, 0, 1, 0], [], []>} : vector<8x8xf32>, vector<8x8xf32>, vector<8x8xf32> -> vector<8x8xf32>
    %148 = vector.extract_strided_slice %35 {offsets = [16, 0], sizes = [8, 32], strides = [1, 1]} : vector<32x32xf32> to vector<8x32xf32>
    %cst_57 = arith.constant dense<0.000000e+00> : vector<8x32xf32>
    %149 = tpu.matmul %147, %148, %cst_57 {dimension_numbers = #tpu.dot_dimension_numbers<[1], [0], [0], [1], [0, 0, 1, 1], [], []>} : vector<8x8xf32>, vector<8x32xf32>, vector<8x32xf32> -> vector<8x32xf32>
    %150 = arith.addf %143, %149 : vector<8x32xf32>
    %151 = vector.extract_strided_slice %126 {offsets = [3, 0, 0], sizes = [1, 8, 8], strides = [1, 1, 1]} : vector<8x8x8xf32> to vector<1x8x8xf32>
    %152 = vector.shape_cast %151 : vector<1x8x8xf32> to vector<8x8xf32>
    %153 = vector.extract_strided_slice %45 {offsets = [24, 0], sizes = [8, 8], strides = [1, 1]} : vector<32x8xf32> to vector<8x8xf32>
    %cst_58 = arith.constant dense<0.000000e+00> : vector<8x8xf32>
    %154 = tpu.matmul %152, %153, %cst_58 {dimension_numbers = #tpu.dot_dimension_numbers<[1], [1], [0], [0], [0, 0, 1, 0], [], []>} : vector<8x8xf32>, vector<8x8xf32>, vector<8x8xf32> -> vector<8x8xf32>
    %155 = vector.extract_strided_slice %35 {offsets = [24, 0], sizes = [8, 32], strides = [1, 1]} : vector<32x32xf32> to vector<8x32xf32>
    %cst_59 = arith.constant dense<0.000000e+00> : vector<8x32xf32>
    %156 = tpu.matmul %154, %155, %cst_59 {dimension_numbers = #tpu.dot_dimension_numbers<[1], [0], [0], [1], [0, 0, 1, 1], [], []>} : vector<8x8xf32>, vector<8x32xf32>, vector<8x32xf32> -> vector<8x32xf32>
    %157 = arith.addf %150, %156 : vector<8x32xf32>
    %cst_60 = arith.constant 0.000000e+00 : f32
    %158 = vector.broadcast %cst_60 : f32 to vector<8x32xf32>
    %159 = vector.extract_strided_slice %126 {offsets = [4, 0, 0], sizes = [1, 8, 8], strides = [1, 1, 1]} : vector<8x8x8xf32> to vector<1x8x8xf32>
    %160 = vector.shape_cast %159 : vector<1x8x8xf32> to vector<8x8xf32>
    %161 = vector.extract_strided_slice %77 {offsets = [0, 0], sizes = [8, 8], strides = [1, 1]} : vector<32x8xf32> to vector<8x8xf32>
    %cst_61 = arith.constant dense<0.000000e+00> : vector<8x8xf32>
    %162 = tpu.matmul %160, %161, %cst_61 {dimension_numbers = #tpu.dot_dimension_numbers<[1], [1], [0], [0], [0, 0, 1, 0], [], []>} : vector<8x8xf32>, vector<8x8xf32>, vector<8x8xf32> -> vector<8x8xf32>
    %163 = vector.extract_strided_slice %35 {offsets = [0, 0], sizes = [8, 32], strides = [1, 1]} : vector<32x32xf32> to vector<8x32xf32>
    %cst_62 = arith.constant dense<0.000000e+00> : vector<8x32xf32>
    %164 = tpu.matmul %162, %163, %cst_62 {dimension_numbers = #tpu.dot_dimension_numbers<[1], [0], [0], [1], [0, 0, 1, 1], [], []>} : vector<8x8xf32>, vector<8x32xf32>, vector<8x32xf32> -> vector<8x32xf32>
    %165 = arith.addf %158, %164 : vector<8x32xf32>
    %166 = vector.extract_strided_slice %126 {offsets = [5, 0, 0], sizes = [1, 8, 8], strides = [1, 1, 1]} : vector<8x8x8xf32> to vector<1x8x8xf32>
    %167 = vector.shape_cast %166 : vector<1x8x8xf32> to vector<8x8xf32>
    %168 = vector.extract_strided_slice %77 {offsets = [8, 0], sizes = [8, 8], strides = [1, 1]} : vector<32x8xf32> to vector<8x8xf32>
    %cst_63 = arith.constant dense<0.000000e+00> : vector<8x8xf32>
    %169 = tpu.matmul %167, %168, %cst_63 {dimension_numbers = #tpu.dot_dimension_numbers<[1], [1], [0], [0], [0, 0, 1, 0], [], []>} : vector<8x8xf32>, vector<8x8xf32>, vector<8x8xf32> -> vector<8x8xf32>
    %170 = vector.extract_strided_slice %35 {offsets = [8, 0], sizes = [8, 32], strides = [1, 1]} : vector<32x32xf32> to vector<8x32xf32>
    %cst_64 = arith.constant dense<0.000000e+00> : vector<8x32xf32>
    %171 = tpu.matmul %169, %170, %cst_64 {dimension_numbers = #tpu.dot_dimension_numbers<[1], [0], [0], [1], [0, 0, 1, 1], [], []>} : vector<8x8xf32>, vector<8x32xf32>, vector<8x32xf32> -> vector<8x32xf32>
    %172 = arith.addf %165, %171 : vector<8x32xf32>
    %173 = vector.extract_strided_slice %126 {offsets = [6, 0, 0], sizes = [1, 8, 8], strides = [1, 1, 1]} : vector<8x8x8xf32> to vector<1x8x8xf32>
    %174 = vector.shape_cast %173 : vector<1x8x8xf32> to vector<8x8xf32>
    %175 = vector.extract_strided_slice %77 {offsets = [16, 0], sizes = [8, 8], strides = [1, 1]} : vector<32x8xf32> to vector<8x8xf32>
    %cst_65 = arith.constant dense<0.000000e+00> : vector<8x8xf32>
    %176 = tpu.matmul %174, %175, %cst_65 {dimension_numbers = #tpu.dot_dimension_numbers<[1], [1], [0], [0], [0, 0, 1, 0], [], []>} : vector<8x8xf32>, vector<8x8xf32>, vector<8x8xf32> -> vector<8x8xf32>
    %177 = vector.extract_strided_slice %35 {offsets = [16, 0], sizes = [8, 32], strides = [1, 1]} : vector<32x32xf32> to vector<8x32xf32>
    %cst_66 = arith.constant dense<0.000000e+00> : vector<8x32xf32>
    %178 = tpu.matmul %176, %177, %cst_66 {dimension_numbers = #tpu.dot_dimension_numbers<[1], [0], [0], [1], [0, 0, 1, 1], [], []>} : vector<8x8xf32>, vector<8x32xf32>, vector<8x32xf32> -> vector<8x32xf32>
    %179 = arith.addf %172, %178 : vector<8x32xf32>
    %180 = vector.extract_strided_slice %126 {offsets = [7, 0, 0], sizes = [1, 8, 8], strides = [1, 1, 1]} : vector<8x8x8xf32> to vector<1x8x8xf32>
    %181 = vector.shape_cast %180 : vector<1x8x8xf32> to vector<8x8xf32>
    %182 = vector.extract_strided_slice %77 {offsets = [24, 0], sizes = [8, 8], strides = [1, 1]} : vector<32x8xf32> to vector<8x8xf32>
    %cst_67 = arith.constant dense<0.000000e+00> : vector<8x8xf32>
    %183 = tpu.matmul %181, %182, %cst_67 {dimension_numbers = #tpu.dot_dimension_numbers<[1], [1], [0], [0], [0, 0, 1, 0], [], []>} : vector<8x8xf32>, vector<8x8xf32>, vector<8x8xf32> -> vector<8x8xf32>
    %184 = vector.extract_strided_slice %35 {offsets = [24, 0], sizes = [8, 32], strides = [1, 1]} : vector<32x32xf32> to vector<8x32xf32>
    %cst_68 = arith.constant dense<0.000000e+00> : vector<8x32xf32>
    %185 = tpu.matmul %183, %184, %cst_68 {dimension_numbers = #tpu.dot_dimension_numbers<[1], [0], [0], [1], [0, 0, 1, 1], [], []>} : vector<8x8xf32>, vector<8x32xf32>, vector<8x32xf32> -> vector<8x32xf32>
    %186 = arith.addf %179, %185 : vector<8x32xf32>
    %187 = tpu.concatenate %157, %186 in 0 : vector<8x32xf32>, vector<8x32xf32> -> vector<16x32xf32>
    %c0_69 = arith.constant 0 : index
    %c0_70 = arith.constant 0 : index
    %188 = vector.load %arg10[%c0_69, %c0_70] : memref<1x32xf32, #tpu.memory_space<vmem>>, vector<1x32xf32>
    %189 = vector.broadcast %188 : vector<1x32xf32> to vector<16x32xf32>
    %190 = arith.addf %187, %189 : vector<16x32xf32>
    %191 = arith.addf %190, %1 : vector<16x32xf32>
    %c0_71 = arith.constant 0 : index
    %c0_72 = arith.constant 0 : index
    %192 = vector.load %arg11[%c0_71, %c0_72] : memref<1x32xf32, #tpu.memory_space<vmem>>, vector<1x32xf32>
    %c0_73 = arith.constant 0 : index
    %c0_74 = arith.constant 0 : index
    %193 = vector.load %arg12[%c0_73, %c0_74] : memref<1x32xf32, #tpu.memory_space<vmem>>, vector<1x32xf32>
    %cst_75 = arith.constant dense<0.000000e+00> : vector<16xf32>
    %194 = vector.multi_reduction <add>, %191, %cst_75 [1] : vector<16x32xf32> to vector<16xf32>
    %195 = vector.shape_cast %194 : vector<16xf32> to vector<16x1xf32>
    %cst_76 = arith.constant 3.200000e+01 : f32
    %196 = vector.broadcast %cst_76 : f32 to vector<16x1xf32>
    %197 = arith.divf %195, %196 : vector<16x1xf32>
    %198 = vector.broadcast %197 : vector<16x1xf32> to vector<16x32xf32>
    %199 = arith.subf %191, %198 : vector<16x32xf32>
    %200 = arith.mulf %199, %199 : vector<16x32xf32>
    %cst_77 = arith.constant dense<0.000000e+00> : vector<16xf32>
    %201 = vector.multi_reduction <add>, %200, %cst_77 [1] : vector<16x32xf32> to vector<16xf32>
    %202 = vector.shape_cast %201 : vector<16xf32> to vector<16x1xf32>
    %cst_78 = arith.constant 3.200000e+01 : f32
    %203 = vector.broadcast %cst_78 : f32 to vector<16x1xf32>
    %204 = arith.divf %202, %203 : vector<16x1xf32>
    %205 = vector.broadcast %197 : vector<16x1xf32> to vector<16x32xf32>
    %206 = arith.subf %191, %205 : vector<16x32xf32>
    %cst_79 = arith.constant 9.99999997E-7 : f32
    %207 = vector.broadcast %cst_79 : f32 to vector<16x1xf32>
    %208 = arith.addf %204, %207 : vector<16x1xf32>
    %209 = math.rsqrt %208 : vector<16x1xf32>
    %210 = vector.broadcast %209 : vector<16x1xf32> to vector<16x32xf32>
    %211 = arith.mulf %206, %210 : vector<16x32xf32>
    %212 = vector.broadcast %192 : vector<1x32xf32> to vector<16x32xf32>
    %213 = arith.mulf %211, %212 : vector<16x32xf32>
    %214 = vector.broadcast %193 : vector<1x32xf32> to vector<16x32xf32>
    %215 = arith.addf %213, %214 : vector<16x32xf32>
    %c0_80 = arith.constant 0 : index
    %c0_81 = arith.constant 0 : index
    %216 = vector.load %arg13[%c0_80, %c0_81] : memref<32x64xf32, #tpu.memory_space<vmem>>, vector<32x64xf32>
    %cst_82 = arith.constant dense<0.000000e+00> : vector<16x64xf32>
    %217 = tpu.matmul %215, %216, %cst_82 {dimension_numbers = #tpu.dot_dimension_numbers<[1], [0], [0], [1], [0, 0, 1, 1], [], []>} : vector<16x32xf32>, vector<32x64xf32>, vector<16x64xf32> -> vector<16x64xf32>
    %c0_83 = arith.constant 0 : index
    %c0_84 = arith.constant 0 : index
    %218 = vector.load %arg14[%c0_83, %c0_84] : memref<1x64xf32, #tpu.memory_space<vmem>>, vector<1x64xf32>
    %219 = vector.broadcast %218 : vector<1x64xf32> to vector<16x64xf32>
    %220 = arith.addf %217, %219 : vector<16x64xf32>
    %cst_85 = arith.constant 0.000000e+00 : f32
    %221 = vector.broadcast %cst_85 : f32 to vector<16x64xf32>
    %222 = arith.maximumf %220, %221 : vector<16x64xf32>
    %c0_86 = arith.constant 0 : index
    %c0_87 = arith.constant 0 : index
    %223 = vector.load %arg15[%c0_86, %c0_87] : memref<64x32xf32, #tpu.memory_space<vmem>>, vector<64x32xf32>
    %cst_88 = arith.constant dense<0.000000e+00> : vector<16x32xf32>
    %224 = tpu.matmul %222, %223, %cst_88 {dimension_numbers = #tpu.dot_dimension_numbers<[1], [0], [0], [1], [0, 0, 1, 1], [], []>} : vector<16x64xf32>, vector<64x32xf32>, vector<16x32xf32> -> vector<16x32xf32>
    %c0_89 = arith.constant 0 : index
    %c0_90 = arith.constant 0 : index
    %225 = vector.load %arg16[%c0_89, %c0_90] : memref<1x32xf32, #tpu.memory_space<vmem>>, vector<1x32xf32>
    %226 = vector.broadcast %225 : vector<1x32xf32> to vector<16x32xf32>
    %227 = arith.addf %224, %226 : vector<16x32xf32>
    %228 = arith.addf %227, %191 : vector<16x32xf32>
    %229 = vector.shape_cast %228 : vector<16x32xf32> to vector<2x8x32xf32>
    %c0_91 = arith.constant 0 : index
    %c0_92 = arith.constant 0 : index
    %c0_93 = arith.constant 0 : index
    %230 = vector.load %arg17[%c0_91, %c0_92, %c0_93] : memref<2x8x32xf32, #tpu.memory_space<vmem>>, vector<2x8x32xf32>
    tpu.vector_store %arg17[%c0_91, %c0_92, %c0_93], %229 {strides = array<i32>} : memref<2x8x32xf32, #tpu.memory_space<vmem>>, vector<2x8x32xf32>,
    return
  }
  func.func @transform_0(%arg0: i32) -> (i32, i32, i32) {
    %c0_i32 = arith.constant 0 : i32
    %c0_i32_0 = arith.constant 0 : i32
    %c0_i32_1 = arith.constant 0 : i32
    return %arg0, %c0_i32, %c0_i32_0 : i32, i32, i32
  }
  func.func @transform_1(%arg0: i32) -> (i32, i32, i32) {
    %c0_i32 = arith.constant 0 : i32
    %c0_i32_0 = arith.constant 0 : i32
    %c0_i32_1 = arith.constant 0 : i32
    return %arg0, %c0_i32, %c0_i32_0 : i32, i32, i32
  }
  func.func @transform_2(%arg0: i32) -> (i32, i32) {
    %c0_i32 = arith.constant 0 : i32
    %c0_i32_0 = arith.constant 0 : i32
    %c0_i32_1 = arith.constant 0 : i32
    return %c0_i32, %c0_i32_0 : i32, i32
  }
  func.func @transform_3(%arg0: i32) -> (i32, i32) {
    %c0_i32 = arith.constant 0 : i32
    %c0_i32_0 = arith.constant 0 : i32
    %c0_i32_1 = arith.constant 0 : i32
    return %c0_i32, %c0_i32_0 : i32, i32
  }
  func.func @transform_4(%arg0: i32) -> (i32, i32) {
    %c0_i32 = arith.constant 0 : i32
    %c0_i32_0 = arith.constant 0 : i32
    %c0_i32_1 = arith.constant 0 : i32
    return %c0_i32, %c0_i32_0 : i32, i32
  }
  func.func @transform_5(%arg0: i32) -> (i32, i32) {
    %c0_i32 = arith.constant 0 : i32
    %c0_i32_0 = arith.constant 0 : i32
    %c0_i32_1 = arith.constant 0 : i32
    return %c0_i32, %c0_i32_0 : i32, i32
  }
  func.func @transform_6(%arg0: i32) -> (i32, i32) {
    %c0_i32 = arith.constant 0 : i32
    %c0_i32_0 = arith.constant 0 : i32
    %c0_i32_1 = arith.constant 0 : i32
    return %c0_i32, %c0_i32_0 : i32, i32
  }
  func.func @transform_7(%arg0: i32) -> (i32, i32) {
    %c0_i32 = arith.constant 0 : i32
    %c0_i32_0 = arith.constant 0 : i32
    %c0_i32_1 = arith.constant 0 : i32
    return %c0_i32, %c0_i32_0 : i32, i32
  }
  func.func @transform_8(%arg0: i32) -> (i32, i32) {
    %c0_i32 = arith.constant 0 : i32
    %c0_i32_0 = arith.constant 0 : i32
    %c0_i32_1 = arith.constant 0 : i32
    return %c0_i32, %c0_i32_0 : i32, i32
  }
  func.func @transform_9(%arg0: i32) -> (i32, i32) {
    %c0_i32 = arith.constant 0 : i32
    %c0_i32_0 = arith.constant 0 : i32
    %c0_i32_1 = arith.constant 0 : i32
    return %c0_i32, %c0_i32_0 : i32, i32
  }
  func.func @transform_10(%arg0: i32) -> (i32, i32) {
    %c0_i32 = arith.constant 0 : i32
    %c0_i32_0 = arith.constant 0 : i32
    %c0_i32_1 = arith.constant 0 : i32
    return %c0_i32, %c0_i32_0 : i32, i32
  }
  func.func @transform_11(%arg0: i32) -> (i32, i32) {
    %c0_i32 = arith.constant 0 : i32
    %c0_i32_0 = arith.constant 0 : i32
    %c0_i32_1 = arith.constant 0 : i32
    return %c0_i32, %c0_i32_0 : i32, i32
  }
  func.func @transform_12(%arg0: i32) -> (i32, i32) {
    %c0_i32 = arith.constant 0 : i32
    %c0_i32_0 = arith.constant 0 : i32
    %c0_i32_1 = arith.constant 0 : i32
    return %c0_i32, %c0_i32_0 : i32, i32
  }
  func.func @transform_13(%arg0: i32) -> (i32, i32) {
    %c0_i32 = arith.constant 0 : i32
    %c0_i32_0 = arith.constant 0 : i32
    %c0_i32_1 = arith.constant 0 : i32
    return %c0_i32, %c0_i32_0 : i32, i32
  }
  func.func @transform_14(%arg0: i32) -> (i32, i32) {
    %c0_i32 = arith.constant 0 : i32
    %c0_i32_0 = arith.constant 0 : i32
    %c0_i32_1 = arith.constant 0 : i32
    return %c0_i32, %c0_i32_0 : i32, i32
  }
  func.func @transform_15(%arg0: i32) -> (i32, i32) {
    %c0_i32 = arith.constant 0 : i32
    %c0_i32_0 = arith.constant 0 : i32
    %c0_i32_1 = arith.constant 0 : i32
    return %c0_i32, %c0_i32_0 : i32, i32
  }
  func.func @transform_16(%arg0: i32) -> (i32, i32, i32) {
    %c0_i32 = arith.constant 0 : i32
    %c0_i32_0 = arith.constant 0 : i32
    %c0_i32_1 = arith.constant 0 : i32
    return %arg0, %c0_i32, %c0_i32_0 : i32, i32, i32
  }
  func.func @transform_17(%arg0: i32) -> (i32, i32, i32, i32) {
    %c0_i32 = arith.constant 0 : i32
    %c0_i32_0 = arith.constant 0 : i32
    %c0_i32_1 = arith.constant 0 : i32
    %c0_i32_2 = arith.constant 0 : i32
    return %arg0, %c0_i32, %c0_i32_0, %c0_i32_1 : i32, i32, i32, i32
  }
}

</mosaic_0001>

<bundles_post_ra>
// kernel: tpu_custom_call.1
= control target key start
LH: loop header
LB: loop body
LE: loop exit
PB: predicated region body
PF: predicated region fallthrough
CT: control target
= control target key end

     0   :  { %s3799_s0 = inlined_call_operand.vmem [shape: f32[2,8,32], index: 0, kind: input, shape index: {}]   ;;  %s3800_s1 = inlined_call_operand.vmem [shape: s32[2,1,8], index: 1, kind: input, shape index: {}]   ;;  %s3801_s2 = inlined_call_operand.vmem [shape: f32[1,32], index: 2, kind: input, shape index: {}]   ;;  %s3802_s3 = inlined_call_operand.vmem [shape: f32[1,32], index: 3, kind: input, shape index: {}]   ;;  %s3803_s4 = inlined_call_operand.vmem [shape: f32[32,32], index: 4, kind: input, shape index: {}]   ;;  %s3804_s5 = inlined_call_operand.vmem [shape: f32[1,32], index: 5, kind: input, shape index: {}]   ;;  %s3805_s6 = inlined_call_operand.vmem [shape: f32[64,32], index: 6, kind: input, shape index: {}]   ;;  %s3806_s7 = inlined_call_operand.vmem [shape: f32[64,1], index: 7, kind: input, shape index: {}]   ;;  %s3807_s8 = inlined_call_operand.vmem [shape: f32[32,32], index: 8, kind: input, shape index: {}]   ;;  %s3808_s9 = inlined_call_operand.vmem [shape: f32[1,32], index: 9, kind: input, shape index: {}]   ;;  %s3809_s10 = inlined_call_operand.vmem [shape: f32[1,32], index: 10, kind: input, shape index: {}]   ;;  %s3810_s11 = inlined_call_operand.vmem [shape: f32[1,32], index: 11, kind: input, shape index: {}]   ;;  %s3811_s12 = inlined_call_operand.vmem [shape: f32[32,64], index: 12, kind: input, shape index: {}]   ;;  %s3812_s13 = inlined_call_operand.vmem [shape: f32[1,64], index: 13, kind: input, shape index: {}]   ;;  %s3813_s14 = inlined_call_operand.vmem [shape: f32[64,32], index: 14, kind: input, shape index: {}]   ;;  %s3814_s15 = inlined_call_operand.vmem [shape: f32[1,32], index: 15, kind: input, shape index: {}]   ;;  %s3815_s16 = inlined_call_operand.hbm [shape: f32[2,8,32], index: 16, kind: output, shape index: {0}]   ;;  %s3816_s17 = inlined_call_operand.hbm [shape: f32[2,4,8,8], index: 17, kind: output, shape index: {1}]  }
   0x1   :  { %3819 = sst [smem:[#allocation8_spill]] %s3799_s0 }
   0x2   :  { %3820 = sst [smem:[#allocation9_spill]] %s3800_s1 }
   0x3   :  { %23 = vsyncpa [#allocation3], 0  ;;  %s3821_s26 = sld [smem:[#allocation8_spill]]  ;;  %vm61_vm0 = vcmask 261120  }
   0x9   :  { %v3291_v0 = vld [vmem:[%s3821_s26] sm:$0xff]  ;;  %v3296_v1 = vld [vmem:[%s3821_s26 + $0x8] sm:$0xff] }
   0xa   :  { %24 = vsyncpa [#allocation5], 0  ;;  %v62_v2 = vsel %vm61_vm0, %v3291_v0, 0.0  ;;  %v65_v3 = vsel %vm61_vm0, %v3296_v1, 0.0  ;;  %v105_v14 = vld [vmem:[%s3803_s4] sm:$0xff]  ;;  %v106_v15 = vld [vmem:[%s3803_s4 + $0x8] sm:$0xff] }
   0xb   :  { %63 = vadd.xlane.f32.xlu0 %v62_v2  ;;  %v3054_v16 = vpack.c.bf16 %v106_v15, %v105_v14  ;;  %v107_v17 = vld [vmem:[%s3803_s4 + $0x10] sm:$0xff]  ;;  %v108_v18 = vld [vmem:[%s3803_s4 + $0x18] sm:$0xff]  ;;  %v207_v20 = vld [vmem:[%s3806_s7] sm:$0xff]  ;;  %v3188_v22 = vmov 0   ;;  %v3189_v43 = vmov 0.0   ;;  %vm3190_vm1 = vmmov 0  }
   0xc   :  { %v3058_v19 = vpack.c.bf16 %v108_v18, %v107_v17  ;;  %v3324_v21 = vld [vmem:[%s3805_s6 + $0x10] sm:$0xff]  ;;  %3098 = vset.pattern.permute.xlu0 %v3188_v22  ;;  %v208_v23 = vld [vmem:[%s3806_s7 + $0x8] sm:$0xff]  ;;  %3099 = vset.pattern.permute.xlu1 %v3188_v22  ;;  %v2713_v31 = vld [vmem:[%s3801_s2] ss:$0 sm:$0xff]  ;;  %s3191_s22 = smov 120   ;;  %vm403_vm2 = vcmask 64512   ;;  %v221_v15 = vlaneseq }
   0xd   :  { %3055 = vmatprep.subr.bf16.mxu0 %v3054_v16  ;;  %2881 = vmatprep.mubr.msk.f32.mxu1 %vm61_vm0, %v3324_v21  ;;  %v2714_v33 = vld [vmem:[%s3802_s3] ss:$0 sm:$0xff]  ;;  %v3351_v41 = vld [vmem:[%s3805_s6 + $0x18] sm:$0xff]  ;;  %v3360_v42 = vld [vmem:[%s3805_s6 + $0x8] sm:$0xff]  ;;  %s3192_s27 = smov 112   ;;  %s3193_s18 = smov 104  }
   0xe   :  { %3057 = vmatpush3.bf16.msra.mxu0 %v3054_v16  ;;  %v199_v40 = vld [vmem:[%s3805_s6] sm:$0xff]  ;;  %v209_v58 = vld [vmem:[%s3806_s7 + $0x10] sm:$0xff]  ;;  %v204_v60 = vld [vmem:[%s3805_s6 + $0x28] sm:$0xff]  ;;  %s3822_s1 = sld [smem:[#allocation9_spill]]  ;;  %v3458_v17 = vshrl.u32 %v221_v15, 7  ;;  %vm2595_vm10 = vcmask 523264  }
   0xf   :  { %66 = vadd.xlane.f32.xlu0 %v65_v3  ;;  %3059 = vmatprep.subr.bf16.mxu0 %v3058_v19  ;;  %v2715_v44 = vld [vmem:[%s3804_s5] ss:$0 sm:$0xff]  ;;  %v205_v61 = vld [vmem:[%s3805_s6 + $0x30] sm:$0xff]  ;;  %v210_v62 = vld [vmem:[%s3806_s7 + $0x18] sm:$0xff] }
  0x10   :  { %v203_v59 = vld [vmem:[%s3805_s6 + $0x20] sm:$0xff]  ;;  %v206_v63 = vld [vmem:[%s3805_s6 + $0x38] sm:$0xff]  ;;  %v399_v18 = vsub.s32 0, %v3458_v17 }
  0x12   :  { %3061 = vmatpush3.bf16.msra.mxu0 %v3058_v19 }
  0x14   :  { %v219_v16 = vld [vmem:[%s3822_s1] sm:$0x1] }
  0x15   :  { %vm395_vm3 = vcmp.gt.s32.totalorder %v219_v16, 0 }
  0x16   :  { %v396_v19 = vsel %vm395_vm3, 1, %v3188_v22 }
  0x25   :  { %228 = vperm.xlu0 %3098, %v207_v20   ;;  %v3462_v20 = vand.u32 127, %v221_v15 }
  0x27   :  { %vm225_vm4 = vcmp.gt.s32.totalorder %v3462_v20, %v3458_v17 }
  0x98   :  { %v64_v4 = vpop.xlane.xlu0 %63 }
  0x99   :  { %v69_v5 = vmul.f32 0.03125, %v64_v4 }
  0x9b   :  { %v71_v6 = vsub.f32 %v3291_v0, %v69_v5 }
  0x9c   :  { %v67_v7 = vpop.xlane.xlu0 %66 }
  0x9d   :  { %v70_v8 = vmul.f32 0.03125, %v67_v7  ;;  %v73_v9 = vmul.f32 %v71_v6, %v71_v6 }
  0x9f   :  { %v72_v10 = vsub.f32 %v3296_v1, %v70_v8  ;;  %v75_v11 = vsel %vm61_vm0, %v73_v9, 0.0 }
  0xa0   :  { %76 = vadd.xlane.f32.xlu1 %v75_v11 }
  0xa1   :  { %v74_v12 = vmul.f32 %v72_v10, %v72_v10 }
  0xa3   :  { %v78_v13 = vsel %vm61_vm0, %v74_v12, 0.0 }
  0xa4   :  { %79 = vadd.xlane.f32.xlu1 %v78_v13  ;;  %v3375_v49 = vpop.permute.xlu0 %228 }
  0xb5   :  { %233 = vperm.xlu1 %3099, %v208_v23  }
 0x12d   :  { %v77_v24 = vpop.xlane.xlu1 %76 }
 0x12e   :  { %v81_v25 = vmul.f32 0.03125, %v77_v24 }
 0x130   :  { %v83_v26 = vadd.f32 1e-06, %v81_v25 }
 0x131   :  { %v80_v27 = vpop.xlane.xlu1 %79 }
 0x132   :  { %3100 = vrsqrt.f32 %v83_v26  ;;  %v82_v28 = vmul.f32 0.03125, %v80_v27 }
 0x134   :  { %v84_v29 = vadd.f32 1e-06, %v82_v28 }
 0x135   :  { %v3377_v51 = vpop.permute.xlu1 %233 }
 0x136   :  { %3102 = vrsqrt.f32 %v84_v29 }
 0x13c   :  { %v3101_v30 = vpop.eup %3100 }
 0x13d   :  { %v87_v32 = vmul.f32 %v3101_v30, %v71_v6 }
 0x13f   :  { %v95_v34 = vmul.f32 %v2713_v31, %v87_v32 }
 0x140   :  { %v3103_v35 = vpop.eup %3102 }
 0x141   :  { %v103_v36 = vadd.f32 %v2714_v33, %v95_v34  ;;  %v88_v37 = vmul.f32 %v3103_v35, %v72_v10 }
 0x143   :  { %2873 = vmatprep.mubr.msk.f32.mxu0 %vm61_vm0, %v103_v36  ;;  %2876 = vmatprep.subr.msk.mxu0 %vm61_vm0, %v103_v36  ;;  %v96_v38 = vmul.f32 %v2713_v31, %v88_v37 }
 0x144   :  { %3086 = vmatprep.subr.msk.mxu1 %vm61_vm0, %v103_v36 }
 0x145   :  { %3087 = vmatpush3.xpose.msk.msra.mxu1 %vm61_vm0, %v103_v36  ;;  %v3343_v39 = vadd.f32 %v2714_v33, %v96_v38 }
 0x146   :  { %2905 = vmatprep.subr.mxu1 %v3189_v43 }
 0x147   :  { %2874 = vmatmul.mubr.msk.f32.vlgmr.msra.gmra.mrb[0].mxu0 %vm61_vm0, %v3343_v39 }
 0x148   :  { %2877 = vmatpush3.xpose.msk.msra.mxu0 %vm61_vm0, %v103_v36  ;;  %2878 = vmatprep.mubr.msk.f32.mxu0 %vm61_vm0, %v199_v40 }
 0x149   :  { %2882 = vmatmul.mubr.msk.f32.vlgmr.msra.gmra.mrb[0].mxu1 %vm61_vm0, %v3351_v41  ;;  %2890 = vmatprep.subr.mxu0 %v3189_v43 }
 0x14a   :  { %2884 = vmatprep.mubr.msk.f32.mxu1 %vm61_vm0, %v203_v59 }
 0x14b   :  { %2879 = vmatmul.mubr.msk.f32.vlgmr.msra.gmra.mrb[2].mxu0 %vm61_vm0, %v3360_v42 }
 0x14c   :  { %2892 = vmatprep.mubr.msk.f32.mxu0 %vm3190_vm1, %v3189_v43 }
 0x14d   :  { %2885 = vmatmul.mubr.msk.f32.gmra.mrb[2].mxu1 %vm61_vm0, %v204_v60 }
 0x14e   :  { %2887 = vmatprep.mubr.msk.f32.mxu1 %vm61_vm0, %v205_v61 }
 0x151   :  { %2888 = vmatmul.mubr.msk.f32.gmra.mrb[4].mxu1 %vm61_vm0, %v206_v63 }
 0x152   :  { %2907 = vmatprep.mubr.msk.f32.mxu1 %vm3190_vm1, %v3189_v43 }
 0x21a   :  { %v2875_v45 = vpop.f32.mrb[0].mxu0 }
 0x21b   :  { %v3373_v46 = vadd.f32 %v2875_v45, %v2715_v44  ;;  %v188_v47 = vpop.f32.mrb[1].mxu0 }
 0x21c   :  { %v189_v48 = vadd.f32 %v2715_v44, %v188_v47  ;;  %v2883_v50 = vpop.f32.mrb[0].mxu1 }
 0x21d   :  { %v366_v52 = vpop.f32.mrb[1].mxu1  ;;  %v198_v28 = vmul.f32 0.35355338, %v3373_v46 }
 0x21e   :  { %v197_v53 = vmul.f32 0.35355338, %v189_v48  ;;  %v2880_v54 = vpop.f32.mrb[2].mxu0 }
 0x21f   :  { %v356_v55 = vpop.f32.mrb[3].mxu0  ;;  %v362_v57 = vadd.f32 %v2880_v54, %v3377_v51 }
 0x220   :  { %v357_v56 = vadd.f32 %v356_v55, %v3375_v49  ;;  %478 = vrot.lane.b32.xlu1 %v197_v53, %s3191_s22  ;;  %v3447_v11 = vpop.f32.mrb[2].mxu1  ;;  %v212_v55 = vld [vmem:[%s3806_s7 + $0x28] sm:$0xff] }
 0x221   :  { %v3449_v12 = vpop.f32.mrb[3].mxu1 }
 0x222   :  { %2891 = vmatpush3.msra.mxu0 %v357_v56 }
 0x223   :  { %2893 = vmatmul.mubr.msk.f32.vlgmr.msra.gmra.mrb[4].mxu0 %vm403_vm2, %v197_v53  ;;  %2895 = vmatprep.subr.mxu0 %v3189_v43 }
 0x224   :  { %238 = vperm.xlu1 %3099, %v209_v58   ;;  %2896 = vmatpush3.msra.mxu0 %v362_v57  ;;  %v3451_v13 = vpop.f32.mrb[4].mxu1 }
 0x225   :  { %2897 = vmatprep.mubr.msk.f32.mxu0 %vm3190_vm1, %v3189_v43  ;;  %2900 = vmatprep.subr.mxu0 %v3189_v43  ;;  %v3453_v14 = vpop.f32.mrb[5].mxu1 }
 0x228   :  { %553 = vrot.lane.b32.xlu1 %v197_v53, %s3192_s27 }
 0x22c   :  { %243 = vperm.xlu1 %3099, %v210_v62  }
 0x230   :  { %628 = vrot.lane.b32.xlu1 %v197_v53, %s3193_s18 }
 0x292   :  { %v479_v2 = vpop.permute.xlu1 %478 }
 0x293   :  { %2898 = vmatmul.mubr.msk.f32.vlgmr.msra.gmra.mrb[6].mxu0 %vm403_vm2, %v479_v2 }
 0x294   :  { %2902 = vmatprep.mubr.msk.f32.mxu0 %vm3190_vm1, %v3189_v43 }
 0x2a3   :  { %v3416_v3 = vpop.permute.xlu1 %238 }
 0x2a4   :  { %v367_v4 = vadd.f32 %v366_v52, %v3416_v3 }
 0x2a6   :  { %2901 = vmatpush3.msra.mxu0 %v367_v4 }
 0x2a7   :  { %v554_v5 = vpop.permute.xlu1 %553  ;;  %2910 = vmatprep.subr.msk.mxu0 %vm61_vm0, %v3343_v39 }
 0x2a8   :  { %2903 = vmatmul.mubr.msk.f32.vlgmr.msra.gmra.mrb[8].mxu0 %vm403_vm2, %v554_v5  ;;  %v214_v5 = vld [vmem:[%s3806_s7 + $0x38] sm:$0xff] }
 0x2a9   :  { %2912 = vmatprep.mubr.msk.f32.mxu0 %vm61_vm0, %v199_v40 }
 0x2ab   :  { %v3423_v6 = vpop.permute.xlu1 %243 }
 0x2ac   :  { %v372_v7 = vadd.f32 %v2883_v50, %v3423_v6 }
 0x2ad   :  { %2911 = vmatpush3.xpose.msk.msra.mxu0 %vm61_vm0, %v3343_v39 }
 0x2ae   :  { %2906 = vmatpush3.msra.mxu1 %v372_v7  ;;  %2944 = vmatprep.subr.mxu0 %v3189_v43 }
 0x2af   :  { %v629_v8 = vpop.permute.xlu1 %628  ;;  %2924 = vmatprep.subr.mxu1 %v3189_v43 }
 0x2b0   :  { %2908 = vmatmul.mubr.msk.f32.vlgmr.msra.gmra.mrb[6].mxu1 %vm403_vm2, %v629_v8  ;;  %2913 = vmatmul.mubr.msk.f32.vlgmr.msra.gmra.mrb[10].mxu0 %vm61_vm0, %v3360_v42 }
 0x2b1   :  { %2915 = vmatprep.mubr.msk.f32.mxu0 %vm61_vm0, %v3324_v21  ;;  %2926 = vmatprep.mubr.msk.f32.mxu1 %vm3190_vm1, %v3189_v43  ;;  %v400_v21 = vrot.slane %v396_v19, %v399_v18 }
 0x2b3   :  { %vm401_vm5 = vcmp.eq.s32.totalorder %v400_v21, 1 }
 0x2b4   :  { %2916 = vmatmul.mubr.msk.f32.gmra.mrb[12].mxu0 %vm61_vm0, %v3351_v41  ;;  %vm3471_vm6 = vmor %vm401_vm5, %vm225_vm4  ;;  %v211_v41 = vld [vmem:[%s3806_s7 + $0x20] sm:$0xff] }
 0x2b5   :  { %2918 = vmatprep.mubr.msk.f32.mxu0 %vm61_vm0, %v203_v59 }
 0x2b8   :  { %2919 = vmatmul.mubr.msk.f32.gmra.mrb[14].mxu0 %vm61_vm0, %v204_v60 }
 0x2b9   :  { %2921 = vmatprep.mubr.msk.f32.mxu0 %vm61_vm0, %v205_v61 }
 0x2bc   :  { %2922 = vmatmul.mubr.msk.f32.gmra.mrb[16].mxu0 %vm61_vm0, %v206_v63 }
 0x2bd   :  { %2946 = vmatprep.mubr.msk.f32.mxu0 %vm3190_vm1, %v3189_v43 }
 0x2f6   :  { %v3445_v9 = vpop.f32.mrb[4].mxu0 }
 0x2f7   :  { %v2894_v10 = vpop.f32.mrb[5].mxu0  ;;  %v477_v60 = vsel %vm3471_vm6, -1e+18, %v3445_v9 }
 0x2f8   :  { %v1115_v62 = vsel %vm403_vm2, %v477_v60, -inf }
 0x366   :  { %v548_v24 = vpop.f32.mrb[6].mxu0 }
 0x367   :  { %v552_v25 = vsel %vm3471_vm6, -1e+18, %v548_v24  ;;  %v2899_v26 = vpop.f32.mrb[7].mxu0 }
 0x368   :  { %v1118_v27 = vsel %vm403_vm2, %v552_v25, -inf }
 0x369   :  { %1119 = vmax.xlane.f32.xlu1 %v1118_v27 }
 0x37a   :  { %890 = vrot.lane.b32.xlu1 %v198_v28, %s3191_s22 }
 0x37b   :  { %v623_v29 = vpop.f32.mrb[8].mxu0 }
 0x37c   :  { %v2904_v30 = vpop.f32.mrb[9].mxu0  ;;  %v627_v39 = vsel %vm3471_vm6, -1e+18, %v623_v29 }
 0x37d   :  { %v1121_v40 = vsel %vm403_vm2, %v627_v39, -inf }
 0x37e   :  { %965 = vrot.lane.b32.xlu1 %v198_v28, %s3192_s27 }
 0x382   :  { %1040 = vrot.lane.b32.xlu1 %v198_v28, %s3193_s18 }
 0x383   :  { %v698_v31 = vpop.f32.mrb[6].mxu1  ;;  %v2914_v32 = vpop.f32.mrb[10].mxu0 }
 0x384   :  { %v2909_v33 = vpop.f32.mrb[7].mxu1  ;;  %v769_v34 = vpop.f32.mrb[11].mxu0  ;;  %v775_v36 = vadd.f32 %v2914_v32, %v3377_v51  ;;  %v702_v63 = vsel %vm3471_vm6, -1e+18, %v698_v31 }
 0x385   :  { %v770_v35 = vadd.f32 %v769_v34, %v3375_v49  ;;  %v1124_v2 = vsel %vm403_vm2, %v702_v63, -inf }
 0x387   :  { %v2917_v37 = vpop.f32.mrb[12].mxu0  ;;  %2925 = vmatpush3.msra.mxu1 %v770_v35 }
 0x388   :  { %v779_v38 = vpop.f32.mrb[13].mxu0  ;;  %2927 = vmatmul.mubr.msk.f32.vlgmr.msra.gmra.mrb[8].mxu1 %vm403_vm2, %v198_v28  ;;  %2929 = vmatprep.subr.mxu1 %v3189_v43  ;;  %v785_v50 = vadd.f32 %v2917_v37, %v3423_v6 }
 0x389   :  { %2930 = vmatpush3.msra.mxu1 %v775_v36  ;;  %2931 = vmatprep.mubr.msk.f32.mxu1 %vm3190_vm1, %v3189_v43  ;;  %v780_v48 = vadd.f32 %v779_v38, %v3416_v3 }
 0x38a   :  { %2934 = vmatprep.subr.mxu1 %v3189_v43 }
 0x38b   :  { %v2920_v42 = vpop.f32.mrb[14].mxu0 }
 0x38c   :  { %v3495_v44 = vpop.f32.mrb[15].mxu0 }
 0x38f   :  { %v3531_v6 = vpop.f32.mrb[16].mxu0 }
 0x3a6   :  { %1122 = vmax.xlane.f32.xlu1 %v1121_v40 }
 0x3b7   :  { %248 = vperm.xlu1 %3099, %v211_v41  }
 0x3f6   :  { %v1120_v45 = vpop.xlane.xlu1 %1119 }
 0x3f7   :  { %v1140_v46 = vsub.f32 %v552_v25, %v1120_v45 }
 0x3f9   :  { %v1149_v47 = vmul.f32 1.442695, %v1140_v46 }
 0x3fa   :  { %v891_v49 = vpop.permute.xlu1 %890 }
 0x3fb   :  { %3104 = vpow2.f32 %v1149_v47  ;;  %2932 = vmatmul.mubr.msk.f32.vlgmr.msra.gmra.mrb[10].mxu1 %vm403_vm2, %v891_v49 }
 0x3fc   :  { %2935 = vmatpush3.msra.mxu1 %v780_v48  ;;  %2936 = vmatprep.mubr.msk.f32.mxu1 %vm3190_vm1, %v3189_v43 }
 0x3fd   :  { %2939 = vmatprep.subr.mxu1 %v3189_v43 }
 0x3fe   :  { %v966_v51 = vpop.permute.xlu1 %965 }
 0x3ff   :  { %2937 = vmatmul.mubr.msk.f32.vlgmr.msra.gmra.mrb[12].mxu1 %vm403_vm2, %v966_v51 }
 0x400   :  { %2940 = vmatpush3.msra.mxu1 %v785_v50  ;;  %2941 = vmatprep.mubr.msk.f32.mxu1 %vm3190_vm1, %v3189_v43 }
 0x401   :  { %2949 = vmatprep.subr.mxu1 %v3189_v43 }
 0x402   :  { %v1041_v52 = vpop.permute.xlu1 %1040 }
 0x403   :  { %2942 = vmatmul.mubr.msk.f32.vlgmr.msra.gmra.mrb[14].mxu1 %vm403_vm2, %v1041_v52  ;;  %v213_v52 = vld [vmem:[%s3806_s7 + $0x30] sm:$0xff] }
 0x404   :  { %2951 = vmatprep.mubr.msk.f32.mxu1 %vm3190_vm1, %v3189_v43 }
 0x405   :  { %v3105_v53 = vpop.eup %3104 }
 0x406   :  { %v1166_v54 = vsel %vm403_vm2, %v3105_v53, 0.0 }
 0x407   :  { %1167 = vadd.xlane.f32.xlu0 %v1166_v54 }
 0x41d   :  { %253 = vperm.xlu0 %3098, %v212_v55  }
 0x433   :  { %v1123_v56 = vpop.xlane.xlu1 %1122 }
 0x434   :  { %v1141_v57 = vsub.f32 %v627_v39, %v1123_v56 }
 0x436   :  { %v1151_v58 = vmul.f32 1.442695, %v1141_v57 }
 0x437   :  { %v3514_v59 = vpop.permute.xlu1 %248 }
 0x438   :  { %3106 = vpow2.f32 %v1151_v58  ;;  %v377_v61 = vadd.f32 %v3449_v12, %v3514_v59 }
 0x43a   :  { %2945 = vmatpush3.xpose.msk.msra.mxu0 %vm403_vm2, %v377_v61 }
 0x43b   :  { %2954 = vmatprep.subr.mxu0 %v3189_v43 }
 0x43c   :  { %1116 = vmax.xlane.f32.xlu0 %v1115_v62 }
 0x440   :  { %1125 = vmax.xlane.f32.xlu0 %v1124_v2 }
 0x442   :  { %v3107_v3 = vpop.eup %3106 }
 0x443   :  { %v1169_v4 = vsel %vm403_vm2, %v3107_v3, 0.0 }
 0x444   :  { %1170 = vadd.xlane.f32.xlu1 %v1169_v4 }
 0x455   :  { %263 = vperm.xlu1 %3099, %v214_v5  }
 0x45b   :  { %v3533_v7 = vpop.f32.mrb[8].mxu1 }
 0x45c   :  { %v2928_v8 = vpop.f32.mrb[9].mxu1 }
 0x494   :  { %v1168_v9 = vpop.xlane.xlu0 %1167 }
 0x495   :  { %3108 = vrcp.f32 %v1168_v9 }
 0x49c   :  { %v254_v10 = vpop.permute.xlu0 %253 }
 0x49d   :  { %v382_v12 = vadd.f32 %v3447_v11, %v254_v10  ;;  %v3536_v15 = vadd.f32 %v2920_v42, %v254_v10  ;;  %v220_v11 = vld [vmem:[%s3822_s1 + $0x1] sm:$0x1] }
 0x49e   :  { %vm808_vm7 = vcmp.gt.s32.totalorder %v220_v11, 0 }
 0x49f   :  { %v3109_v16 = vpop.eup %3108  ;;  %2950 = vmatpush3.xpose.msk.msra.mxu1 %vm403_vm2, %v382_v12  ;;  %v809_v25 = vsel %vm808_vm7, 1, %v3188_v22 }
 0x4a0   :  { %v1196_v19 = vmul.f32 %v3109_v16, %v1168_v9  ;;  %2959 = vmatprep.subr.mxu1 %v3189_v43  ;;  %v813_v26 = vrot.slane %v809_v25, %v399_v18  ;;  %v3589_v25 = vld [vmem:[%s3807_s8 + $0x8] sm:$0xff] }
 0x4a2   :  { %v1204_v21 = vsub.f32 2.0, %v1196_v19  ;;  %vm814_vm8 = vcmp.eq.s32.totalorder %v813_v26, 1 }
 0x4a3   :  { %vm3553_vm9 = vmor %vm814_vm8, %vm225_vm4 }
 0x4a4   :  { %v1212_v23 = vmul.f32 %v3109_v16, %v1204_v21  ;;  %v889_v4 = vsel %vm3553_vm9, -1e+18, %v3533_v7 }
 0x4a5   :  { %v1127_v8 = vsel %vm403_vm2, %v889_v4, -inf }
 0x4a6   :  { %v1220_v24 = vmul.f32 %v3105_v53, %v1212_v23  ;;  %v3569_v53 = vpop.f32.mrb[17].mxu0 }
 0x4a8   :  { %1228 = vst.msk [vmem:[#allocation4 + $0x8] sm:$0xff] %vm403_vm2, %v1220_v24  ;;  %2952 = vmatmul.mubr.msk.f32.vlgmr.msra.gmra.mrb[16].mxu1 %vm403_vm2, %v1220_v24 }
 0x4a9   :  { %2961 = vmatprep.mubr.msk.f32.mxu1 %vm3190_vm1, %v3189_v43 }
 0x4c9   :  { %v1117_v27 = vpop.xlane.xlu0 %1116 }
 0x4ca   :  { %v1139_v28 = vsub.f32 %v477_v60, %v1117_v27 }
 0x4cc   :  { %v1147_v29 = vmul.f32 1.442695, %v1139_v28 }
 0x4cd   :  { %v1126_v30 = vpop.xlane.xlu0 %1125 }
 0x4ce   :  { %3110 = vpow2.f32 %v1147_v29  ;;  %v1142_v32 = vsub.f32 %v702_v63, %v1126_v30  ;;  %v960_v33 = vpop.f32.mrb[10].mxu1 }
 0x4cf   :  { %v964_v22 = vsel %vm3553_vm9, -1e+18, %v960_v33  ;;  %v2933_v34 = vpop.f32.mrb[11].mxu1 }
 0x4d0   :  { %v1153_v18 = vmul.f32 1.442695, %v1142_v32  ;;  %v1130_v35 = vsel %vm403_vm2, %v964_v22, -inf }
 0x4d1   :  { %v1171_v36 = vpop.xlane.xlu1 %1170  ;;  %1131 = vmax.xlane.f32.xlu1 %v1130_v35 }
 0x4d2   :  { %3112 = vpow2.f32 %v1153_v18  ;;  %v1035_v37 = vpop.f32.mrb[12].mxu1 }
 0x4d3   :  { %3114 = vrcp.f32 %v1171_v36  ;;  %v1039_v17 = vsel %vm3553_vm9, -1e+18, %v1035_v37  ;;  %v2938_v20 = vpop.f32.mrb[13].mxu1 }
 0x4d4   :  { %v1133_v38 = vsel %vm403_vm2, %v1039_v17, -inf }
 0x4d5   :  { %1134 = vmax.xlane.f32.xlu1 %v1133_v38  ;;  %v3571_v54 = vpop.permute.xlu1 %263 }
 0x4d6   :  { %v1110_v39 = vpop.f32.mrb[14].mxu1  ;;  %v392_v33 = vadd.f32 %v3451_v13, %v3571_v54  ;;  %v215_v13 = vld [vmem:[%s3807_s8] sm:$0xff] }
 0x4d7   :  { %v2943_v40 = vpop.f32.mrb[15].mxu1  ;;  %v1114_v9 = vsel %vm3553_vm9, -1e+18, %v1110_v39  ;;  %2960 = vmatpush3.msra.mxu1 %v215_v13 }
 0x4d8   :  { %v3111_v41 = vpop.eup %3110  ;;  %v1136_v19 = vsel %vm403_vm2, %v1114_v9, -inf  ;;  %2969 = vmatprep.subr.mxu1 %v3189_v43 }
 0x4d9   :  { %v1163_v42 = vsel %vm403_vm2, %v3111_v41, 0.0 }
 0x4da   :  { %1164 = vadd.xlane.f32.xlu0 %v1163_v42 }
 0x4dc   :  { %v3113_v45 = vpop.eup %3112 }
 0x4dd   :  { %v3115_v46 = vpop.eup %3114  ;;  %v1172_v47 = vsel %vm403_vm2, %v3113_v45, 0.0 }
 0x4de   :  { %v1197_v48 = vmul.f32 %v3115_v46, %v1171_v36  ;;  %1173 = vadd.xlane.f32.xlu0 %v1172_v47 }
 0x4e0   :  { %v1205_v49 = vsub.f32 2.0, %v1197_v48 }
 0x4e2   :  { %v1213_v50 = vmul.f32 %v3115_v46, %v1205_v49 }
 0x4e4   :  { %v1221_v51 = vmul.f32 %v3107_v3, %v1213_v50 }
 0x4e6   :  { %1229 = vst.msk [vmem:[#allocation4 + $0x10] sm:$0xff] %vm403_vm2, %v1221_v51 }
 0x4f4   :  { %258 = vperm.xlu0 %3098, %v213_v52   ;;  %v3639_v52 = vld [vmem:[%s3807_s8 + $0x10] sm:$0xff] }
 0x55e   :  { %v1132_v55 = vpop.xlane.xlu1 %1131 }
 0x55f   :  { %v1144_v56 = vsub.f32 %v964_v22, %v1132_v55  ;;  %v790_v22 = vadd.f32 %v3495_v44, %v3514_v59 }
 0x561   :  { %v1157_v57 = vmul.f32 1.442695, %v1144_v56 }
 0x562   :  { %v1135_v58 = vpop.xlane.xlu1 %1134 }
 0x563   :  { %3116 = vpow2.f32 %v1157_v57  ;;  %v1145_v60 = vsub.f32 %v1039_v17, %v1135_v58 }
 0x565   :  { %v1159_v62 = vmul.f32 1.442695, %v1145_v60  ;;  %v3649_v60 = vld [vmem:[%s3807_s8 + $0x18] sm:$0xff] }
 0x567   :  { %v1165_v61 = vpop.xlane.xlu0 %1164 }
 0x568   :  { %3118 = vrcp.f32 %v1165_v61 }
 0x56b   :  { %v1174_v63 = vpop.xlane.xlu0 %1173 }
 0x56c   :  { %3120 = vrcp.f32 %v1174_v63 }
 0x56d   :  { %v3573_v2 = vpop.eup %3116  ;;  %3122 = vpow2.f32 %v1159_v62 }
 0x56e   :  { %v1178_v3 = vsel %vm403_vm2, %v3573_v2, 0.0 }
 0x56f   :  { %1179 = vadd.xlane.f32.xlu0 %v1178_v3 }
 0x572   :  { %v3119_v5 = vpop.eup %3118 }
 0x573   :  { %v1195_v10 = vmul.f32 %v3119_v5, %v1165_v61  ;;  %1128 = vmax.xlane.f32.xlu0 %v1127_v8  ;;  %v3599_v31 = vpop.permute.xlu0 %258 }
 0x574   :  { %v387_v32 = vadd.f32 %v3453_v14, %v3599_v31 }
 0x575   :  { %v1203_v12 = vsub.f32 2.0, %v1195_v10 }
 0x576   :  { %v3121_v16 = vpop.eup %3120 }
 0x577   :  { %v3584_v21 = vpop.eup %3122  ;;  %v1211_v23 = vmul.f32 %v3119_v5, %v1203_v12  ;;  %v1198_v24 = vmul.f32 %v3121_v16, %v1174_v63  ;;  %1137 = vmax.xlane.f32.xlu0 %v1136_v19 }
 0x578   :  { %v1181_v26 = vsel %vm403_vm2, %v3584_v21, 0.0 }
 0x579   :  { %v1219_v11 = vmul.f32 %v3111_v41, %v1211_v23  ;;  %v1206_v7 = vsub.f32 2.0, %v1198_v24 }
 0x57b   :  { %1227 = vst.msk [vmem:[#allocation4] sm:$0xff] %vm403_vm2, %v1219_v11  ;;  %v1214_v27 = vmul.f32 %v3121_v16, %v1206_v7  ;;  %2947 = vmatmul.mubr.msk.f32.vlgmr.msra.gmra.mrb[18].mxu0 %vm403_vm2, %v1219_v11  ;;  %1182 = vadd.xlane.f32.xlu0 %v1181_v26  ;;  %v1383_v28 = vpop.f32.mrb[16].mxu1 }
 0x57c   :  { %2955 = vmatpush3.msra.mxu0 %v3589_v25  ;;  %v2953_v29 = vpop.f32.mrb[17].mxu1  ;;  %2956 = vmatprep.mubr.msk.f32.mxu0 %vm3190_vm1, %v3189_v43 }
 0x57d   :  { %v1222_v30 = vmul.f32 %v3113_v45, %v1214_v27  ;;  %2964 = vmatprep.subr.mxu0 %v3189_v43 }
 0x57f   :  { %1230 = vst.msk [vmem:[#allocation4 + $0x18] sm:$0xff] %vm403_vm2, %v1222_v30  ;;  %2957 = vmatmul.mubr.msk.f32.vlgmr.msra.gmra.mrb[20].mxu0 %vm403_vm2, %v1383_v28 }
 0x580   :  { %2966 = vmatprep.mubr.msk.f32.mxu0 %vm3190_vm1, %v3189_v43 }
 0x583   :  { %2965 = vmatpush3.xpose.msk.msra.mxu0 %vm403_vm2, %v387_v32 }
 0x584   :  { %2974 = vmatprep.subr.mxu0 %v3189_v43 }
 0x586   :  { %2967 = vmatmul.mubr.msk.f32.vlgmr.msra.gmra.mrb[22].mxu0 %vm403_vm2, %v1221_v51 }
 0x587   :  { %2975 = vmatpush3.xpose.msk.msra.mxu0 %vm403_vm2, %v392_v33  ;;  %2976 = vmatprep.mubr.msk.f32.mxu0 %vm3190_vm1, %v3189_v43 }
 0x588   :  { %2984 = vmatprep.subr.mxu0 %v3189_v43 }
 0x58a   :  { %2977 = vmatmul.mubr.msk.f32.vlgmr.msra.gmra.mrb[24].mxu0 %vm403_vm2, %v1222_v30  ;;  %v2768_v30 = vld [vmem:[%s3808_s9] ss:$0 sm:$0xff] }
 0x58b   :  { %2985 = vmatpush3.xpose.msk.msra.mxu0 %vm403_vm2, %v790_v22  ;;  %2986 = vmatprep.mubr.msk.f32.mxu0 %vm3190_vm1, %v3189_v43 }
 0x58c   :  { %2994 = vmatprep.subr.mxu0 %v3189_v43 }
 0x5fc   :  { %v1180_v14 = vpop.xlane.xlu0 %1179 }
 0x5fd   :  { %3124 = vrcp.f32 %v1180_v14 }
 0x600   :  { %v1129_v34 = vpop.xlane.xlu0 %1128 }
 0x601   :  { %v1143_v44 = vsub.f32 %v889_v4, %v1129_v34 }
 0x603   :  { %v1155_v59 = vmul.f32 1.442695, %v1143_v44 }
 0x604   :  { %v1138_v18 = vpop.xlane.xlu0 %1137 }
 0x605   :  { %3126 = vpow2.f32 %v1155_v59  ;;  %v1146_v35 = vsub.f32 %v1114_v9, %v1138_v18 }
 0x607   :  { %v3125_v36 = vpop.eup %3124  ;;  %v1161_v37 = vmul.f32 1.442695, %v1146_v35 }
 0x608   :  { %v1200_v17 = vmul.f32 %v3125_v36, %v1180_v14  ;;  %v1183_v20 = vpop.xlane.xlu0 %1182 }
 0x609   :  { %3128 = vpow2.f32 %v1161_v37 }
 0x60a   :  { %v1208_v38 = vsub.f32 2.0, %v1200_v17  ;;  %3130 = vrcp.f32 %v1183_v20 }
 0x60c   :  { %v1216_v39 = vmul.f32 %v3125_v36, %v1208_v38 }
 0x60e   :  { %v1224_v40 = vmul.f32 %v3573_v2, %v1216_v39 }
 0x60f   :  { %v3127_v41 = vpop.eup %3126 }
 0x610   :  { %1232 = vst.msk [vmem:[#allocation4 + $0x28] sm:$0xff] %vm403_vm2, %v1224_v40  ;;  %v1175_v42 = vsel %vm403_vm2, %v3127_v41, 0.0 }
 0x611   :  { %1176 = vadd.xlane.f32.xlu1 %v1175_v42 }
 0x613   :  { %v3129_v45 = vpop.eup %3128 }
 0x614   :  { %v3131_v46 = vpop.eup %3130  ;;  %v1184_v47 = vsel %vm403_vm2, %v3129_v45, 0.0 }
 0x615   :  { %v1201_v48 = vmul.f32 %v3131_v46, %v1183_v20  ;;  %1185 = vadd.xlane.f32.xlu1 %v1184_v47 }
 0x617   :  { %v1209_v49 = vsub.f32 2.0, %v1201_v48 }
 0x619   :  { %v1217_v50 = vmul.f32 %v3131_v46, %v1209_v49  ;;  %v2769_v49 = vld [vmem:[%s3809_s10] ss:$0 sm:$0xff]  ;;  %s3194_s10 = smov [#allocation4]  }
 0x61b   :  { %v3632_v51 = vmul.f32 %v3584_v21, %v1217_v50 }
 0x61d   :  { %1233 = vst.msk [vmem:[#allocation4 + $0x30] sm:$0xff] %vm403_vm2, %v3632_v51 }
 0x64e   :  { %v1307_v55 = vpop.f32.mrb[18].mxu0 }
 0x64f   :  { %v2948_v56 = vpop.f32.mrb[19].mxu0  ;;  %2962 = vmatmul.mubr.msk.f32.vlgmr.msra.gmra.mrb[18].mxu1 %vm403_vm2, %v1307_v55 }
 0x650   :  { %2970 = vmatpush3.msra.mxu1 %v3639_v52  ;;  %2971 = vmatprep.mubr.msk.f32.mxu1 %vm3190_vm1, %v3189_v43 }
 0x651   :  { %2979 = vmatprep.subr.mxu1 %v3189_v43 }
 0x652   :  { %v1456_v57 = vpop.f32.mrb[20].mxu0 }
 0x653   :  { %v2958_v58 = vpop.f32.mrb[21].mxu0 }
 0x659   :  { %v1605_v61 = vpop.f32.mrb[22].mxu0 }
 0x65a   :  { %v2968_v62 = vpop.f32.mrb[23].mxu0  ;;  %2972 = vmatmul.mubr.msk.f32.vlgmr.msra.gmra.mrb[20].mxu1 %vm403_vm2, %v1605_v61 }
 0x65b   :  { %2980 = vmatpush3.msra.mxu1 %v3649_v60  ;;  %2981 = vmatprep.mubr.msk.f32.mxu1 %vm3190_vm1, %v3189_v43 }
 0x65c   :  { %2989 = vmatprep.subr.mxu1 %v3189_v43 }
 0x65d   :  { %v1755_v63 = vpop.f32.mrb[24].mxu0 }
 0x65e   :  { %v2978_v2 = vpop.f32.mrb[25].mxu0  ;;  %2982 = vmatmul.mubr.msk.f32.vlgmr.msra.gmra.mrb[22].mxu1 %vm403_vm2, %v1755_v63 }
 0x65f   :  { %2991 = vmatprep.mubr.msk.f32.mxu1 %vm3190_vm1, %v3189_v43 }
 0x662   :  { %2990 = vmatpush3.xpose.msk.msra.mxu1 %vm403_vm2, %v3536_v15 }
 0x663   :  { %2999 = vmatprep.subr.mxu1 %v3189_v43 }
 0x665   :  { %2992 = vmatmul.mubr.msk.f32.vlgmr.msra.gmra.mrb[24].mxu1 %vm403_vm2, %v1224_v40 }
 0x666   :  { %3000 = vmatpush3.msra.mxu1 %v215_v13  ;;  %3001 = vmatprep.mubr.msk.f32.mxu1 %vm3190_vm1, %v3189_v43  ;;  %v800_v13 = vadd.f32 %v3569_v53, %v3599_v31 }
 0x667   :  { %3009 = vmatprep.subr.mxu1 %v3189_v43 }
 0x69e   :  { %v1177_v3 = vpop.xlane.xlu1 %1176 }
 0x69f   :  { %3132 = vrcp.f32 %v1177_v3 }
 0x6a2   :  { %v1186_v4 = vpop.xlane.xlu1 %1185 }
 0x6a3   :  { %3134 = vrcp.f32 %v1186_v4 }
 0x6a9   :  { %v3133_v5 = vpop.eup %3132 }
 0x6aa   :  { %v1199_v8 = vmul.f32 %v3133_v5, %v1177_v3 }
 0x6ac   :  { %v1207_v9 = vsub.f32 2.0, %v1199_v8 }
 0x6ad   :  { %v3135_v10 = vpop.eup %3134 }
 0x6ae   :  { %v1215_v12 = vmul.f32 %v3133_v5, %v1207_v9  ;;  %v1202_v15 = vmul.f32 %v3135_v10, %v1186_v4 }
 0x6b0   :  { %v1223_v16 = vmul.f32 %v3127_v41, %v1215_v12  ;;  %v1210_v19 = vsub.f32 2.0, %v1202_v15  ;;  %v2488_v15 = vld [vmem:[%s3811_s12 + $0x10] sm:$0xff] }
 0x6b2   :  { %1231 = vst.msk [vmem:[#allocation4 + $0x20] sm:$0xff] %vm403_vm2, %v1223_v16  ;;  %v1218_v21 = vmul.f32 %v3135_v10, %v1210_v19  ;;  %2987 = vmatmul.mubr.msk.f32.vlgmr.msra.gmra.mrb[26].mxu0 %vm403_vm2, %v1223_v16  ;;  %v2486_v10 = vld [vmem:[%s3811_s12] sm:$0xff]  ;;  %v2489_v16 = vld [vmem:[%s3811_s12 + $0x18] sm:$0xff] }
 0x6b3   :  { %2995 = vmatpush3.msra.mxu0 %v3589_v25  ;;  %2996 = vmatprep.mubr.msk.f32.mxu0 %vm3190_vm1, %v3189_v43  ;;  %v3066_v19 = vpack.c.bf16 %v2489_v16, %v2488_v15 }
 0x6b4   :  { %v1226_v23 = vmul.f32 %v3129_v45, %v1218_v21  ;;  %3004 = vmatprep.subr.mxu0 %v3189_v43  ;;  %v2580_v21 = vld [vmem:[%s3813_s14] sm:$0xff] }
 0x6b6   :  { %1234 = vst.msk [vmem:[#allocation4 + $0x38] sm:$0xff] %vm403_vm2, %v1226_v23 }
 0x722   :  { %v1529_v24 = vpop.f32.mrb[18].mxu1 }
 0x723   :  { %v1530_v11 = vadd.f32 %v1529_v24, %v1456_v57  ;;  %v2963_v7 = vpop.f32.mrb[19].mxu1  ;;  %v2582_v24 = vld [vmem:[%s3813_s14 + $0x10] sm:$0xff] }
 0x724   :  { %v2583_v7 = vld [vmem:[%s3813_s14 + $0x18] sm:$0xff] }
 0x72d   :  { %v1678_v26 = vpop.f32.mrb[20].mxu1 }
 0x72e   :  { %v1682_v27 = vadd.f32 %v1678_v26, %v1530_v11  ;;  %v2973_v28 = vpop.f32.mrb[21].mxu1  ;;  %v3074_v26 = vpack.c.bf16 %v2583_v7, %v2582_v24 }
 0x72f   :  { %v2585_v28 = vld [vmem:[%s3813_s14 + $0x28] sm:$0xff] }
 0x731   :  { %v1828_v29 = vpop.f32.mrb[22].mxu1 }
 0x732   :  { %v1832_v25 = vadd.f32 %v1828_v29, %v1682_v27  ;;  %v2983_v32 = vpop.f32.mrb[23].mxu1  ;;  %v2584_v27 = vld [vmem:[%s3813_s14 + $0x20] sm:$0xff] }
 0x733   :  { %v3078_v29 = vpack.c.bf16 %v2585_v28, %v2584_v27 }
 0x734   :  { %v2438_v33 = vadd.f32 %v2768_v30, %v1832_v25 }
 0x736   :  { %v3677_v22 = vadd.f32 %v2438_v33, %v3291_v0  ;;  %v805_v0 = vadd.f32 %v3531_v6, %v3571_v54 }
 0x738   :  { %v1981_v14 = vpop.f32.mrb[24].mxu1  ;;  %v2444_v34 = vsel %vm61_vm0, %v3677_v22, 0.0 }
 0x739   :  { %v2993_v44 = vpop.f32.mrb[25].mxu1  ;;  %2997 = vmatmul.mubr.msk.f32.vlgmr.msra.gmra.mrb[28].mxu0 %vm403_vm2, %v1981_v14  ;;  %2445 = vadd.xlane.f32.xlu0 %v2444_v34 }
 0x73a   :  { %3005 = vmatpush3.xpose.msk.msra.mxu0 %vm403_vm2, %v800_v13  ;;  %3006 = vmatprep.mubr.msk.f32.mxu0 %vm3190_vm1, %v3189_v43  ;;  %v2586_v44 = vld [vmem:[%s3813_s14 + $0x30] sm:$0xff] }
 0x73b   :  { %3014 = vmatprep.subr.mxu0 %v3189_v43 }
 0x73d   :  { %3007 = vmatmul.mubr.msk.f32.vlgmr.msra.gmra.mrb[30].mxu0 %vm403_vm2, %v3632_v51 }
 0x73e   :  { %3015 = vmatpush3.xpose.msk.msra.mxu0 %vm403_vm2, %v805_v0  ;;  %3016 = vmatprep.mubr.msk.f32.mxu0 %vm3190_vm1, %v3189_v43  ;;  %v2587_v0 = vld [vmem:[%s3813_s14 + $0x38] sm:$0xff] }
 0x741   :  { %3017 = vmatmul.mubr.msk.f32.vlgmr.msra.gmra.mrb[32].mxu0 %vm403_vm2, %v1226_v23  ;;  %v2581_v23 = vld [vmem:[%s3813_s14 + $0x8] sm:$0xff] }
 0x742   :  { %v3070_v11 = vpack.c.bf16 %v2581_v23, %v2580_v21 }
 0x785   :  { %v1905_v53 = vpop.f32.mrb[26].mxu0 }
 0x786   :  { %v2988_v31 = vpop.f32.mrb[27].mxu0  ;;  %3002 = vmatmul.mubr.msk.f32.vlgmr.msra.gmra.mrb[26].mxu1 %vm403_vm2, %v1905_v53  ;;  %v3082_v53 = vpack.c.bf16 %v2587_v0, %v2586_v44 }
 0x787   :  { %3010 = vmatpush3.msra.mxu1 %v3639_v52  ;;  %3011 = vmatprep.mubr.msk.f32.mxu1 %vm3190_vm1, %v3189_v43  ;;  %v2771_v31 = vld [vmem:[%s3812_s13] ss:$0 sm:$0xff] }
 0x788   :  { %3019 = vmatprep.subr.mxu1 %v3189_v43 }
 0x7c6   :  { %v2446_v6 = vpop.xlane.xlu0 %2445 }
 0x7c7   :  { %v2450_v54 = vmul.f32 0.03125, %v2446_v6 }
 0x7c9   :  { %v2452_v59 = vsub.f32 %v3677_v22, %v2450_v54 }
 0x7cb   :  { %v2454_v18 = vmul.f32 %v2452_v59, %v2452_v59 }
 0x7cd   :  { %v2456_v35 = vsel %vm61_vm0, %v2454_v18, 0.0 }
 0x7ce   :  { %2457 = vadd.xlane.f32.xlu0 %v2456_v35 }
 0x80c   :  { %v2054_v36 = vpop.f32.mrb[28].mxu0 }
 0x80d   :  { %v2998_v37 = vpop.f32.mrb[29].mxu0 }
 0x810   :  { %v2203_v17 = vpop.f32.mrb[30].mxu0 }
 0x811   :  { %v3008_v20 = vpop.f32.mrb[31].mxu0  ;;  %3012 = vmatmul.mubr.msk.f32.vlgmr.msra.gmra.mrb[28].mxu1 %vm403_vm2, %v2203_v17 }
 0x812   :  { %3020 = vmatpush3.msra.mxu1 %v3649_v60  ;;  %3021 = vmatprep.mubr.msk.f32.mxu1 %vm3190_vm1, %v3189_v43  ;;  %v2770_v43 = vld [vmem:[%s3810_s11] ss:$0 sm:$0xff]  ;;  %s2698_s11 = sshll.u32 %s3194_s10, 4  ;;  %s2699_s11 = int_to_ptr.vmem [resolvable:$true] %s2698_s11 }
 0x813   :  { %3071 = vmatprep.subr.bf16.mxu1 %v3070_v11  ;;  %s3140_s14 = scalar_lea.vmem %s2699_s11, 1024  ;;  %p3145_p1 = scmp.lt.s32.totalorder %s2699_s11, %s2699_s11 }
 0x814   :  { %v2353_v38 = vpop.f32.mrb[32].mxu0  ;;  %p3141_p0 = scmp.ne.s32.totalorder %s2699_s11, %s3140_s14  ;;  %p3146_p2 = scmp.lt.s32.totalorder %s3140_s14, %s3140_s14 }
 0x815   :  { %v3018_v39 = vpop.f32.mrb[33].mxu0  ;;  %3022 = vmatmul.mubr.msk.f32.vlgmr.msra.gmra.mrb[30].mxu1 %vm403_vm2, %v2353_v38 }
 0x816   :  { %3073 = vmatpush3.bf16.msra.mxu1 %v3070_v11  ;;  %p3147_p3 = por %p3146_p2, %p3145_p1 }
 0x817   :  { %3075 = vmatprep.subr.bf16.mxu1 %v3074_v26 }
 0x818   :  { %p3148_p4 = pnand %p3147_p3, %p3141_p0 }
 0x81a   :  { %3077 = vmatpush3.bf16.msra.mxu1 %v3074_v26 }
 0x81b   :  { %3079 = vmatprep.subr.bf16.mxu1 %v3078_v29 }
 0x81e   :  { %3081 = vmatpush3.bf16.msra.mxu1 %v3078_v29 }
 0x81f   :  { %3083 = vmatprep.subr.bf16.mxu1 %v3082_v53 }
 0x822   :  { %3085 = vmatpush3.bf16.msra.mxu1 %v3082_v53 }
 0x859   :  { %v2127_v40 = vpop.f32.mrb[26].mxu1 }
 0x85a   :  { %v2128_v41 = vadd.f32 %v2127_v40, %v2054_v36  ;;  %v3003_v42 = vpop.f32.mrb[27].mxu1 }
 0x85b   :  { %v2458_v45 = vpop.xlane.xlu0 %2457 }
 0x85c   :  { %v2462_v46 = vmul.f32 0.03125, %v2458_v45 }
 0x85e   :  { %v2464_v47 = vadd.f32 1e-06, %v2462_v46 }
 0x860   :  { %3136 = vrsqrt.f32 %v2464_v47 }
 0x86a   :  { %v3137_v48 = vpop.eup %3136 }
 0x86b   :  { %v2468_v50 = vmul.f32 %v3137_v48, %v2452_v59 }
 0x86d   :  { %v2476_v51 = vmul.f32 %v2769_v49, %v2468_v50 }
 0x86f   :  { %v2484_v52 = vadd.f32 %v2770_v43, %v2476_v51 }
 0x871   :  { %3032 = vmatprep.mubr.msk.f32.mxu0 %vm61_vm0, %v2484_v52 }
 0x8e4   :  { %v2276_v55 = vpop.f32.mrb[28].mxu1 }
 0x8e5   :  { %v2280_v56 = vadd.f32 %v2276_v55, %v2128_v41  ;;  %v3013_v57 = vpop.f32.mrb[29].mxu1 }
 0x8e8   :  { %v2426_v58 = vpop.f32.mrb[30].mxu1 }
 0x8e9   :  { %v2430_v60 = vadd.f32 %v2426_v58, %v2280_v56  ;;  %v3023_v61 = vpop.f32.mrb[31].mxu1 }
 0x8eb   :  { %v2439_v62 = vadd.f32 %v2768_v30, %v2430_v60 }
 0x8ed   :  { %v3716_v63 = vadd.f32 %v2439_v62, %v3296_v1  ;;  %v2487_v1 = vld [vmem:[%s3811_s12 + $0x8] sm:$0xff] }
 0x8ee   :  { %v3062_v12 = vpack.c.bf16 %v2487_v1, %v2486_v10 }
 0x8ef   :  { %v2447_v2 = vsel %vm61_vm0, %v3716_v63, 0.0 }
 0x8f0   :  { %2448 = vadd.xlane.f32.xlu1 %v2447_v2  ;;  %3063 = vmatprep.subr.bf16.mxu0 %v3062_v12 }
 0x8f1   :  { %3065 = vmatpush3.bf16.msra.mxu0 %v3062_v12 }
 0x8f2   :  { %3067 = vmatprep.subr.bf16.mxu0 %v3066_v19 }
 0x8f5   :  { %3069 = vmatpush3.bf16.msra.mxu0 %v3066_v19 }
 0x97d   :  { %v2449_v3 = vpop.xlane.xlu1 %2448 }
 0x97e   :  { %v2451_v4 = vmul.f32 0.03125, %v2449_v3 }
 0x980   :  { %v2453_v5 = vsub.f32 %v3716_v63, %v2451_v4 }
 0x982   :  { %v2455_v8 = vmul.f32 %v2453_v5, %v2453_v5 }
 0x984   :  { %v2459_v9 = vsel %vm61_vm0, %v2455_v8, 0.0 }
 0x985   :  { %2460 = vadd.xlane.f32.xlu1 %v2459_v9 }
 0xa12   :  { %v2461_v30 = vpop.xlane.xlu1 %2460 }
 0xa13   :  { %v2463_v25 = vmul.f32 0.03125, %v2461_v30 }
 0xa15   :  { %v2465_v32 = vadd.f32 1e-06, %v2463_v25 }
 0xa17   :  { %3138 = vrsqrt.f32 %v2465_v32 }
 0xa21   :  { %v3139_v33 = vpop.eup %3138 }
 0xa22   :  { %v2469_v13 = vmul.f32 %v3139_v33, %v2453_v5 }
 0xa24   :  { %v2477_v14 = vmul.f32 %v2769_v49, %v2469_v13 }
 0xa26   :  { %v2485_v34 = vadd.f32 %v2770_v43, %v2477_v14 }
 0xa28   :  { %3033 = vmatmul.mubr.msk.f32.vlgmr.msra.gmra.mrb[34].mxu0 %vm61_vm0, %v2485_v34 }
 0xafb   :  { %v3034_v6 = vpop.f32.mrb[34].mxu0 }
 0xafc   :  { %v2575_v54 = vadd.f32 %v3034_v6, %v2771_v31  ;;  %v2569_v59 = vpop.f32.mrb[35].mxu0 }
 0xafd   :  { %v2570_v18 = vadd.f32 %v2771_v31, %v2569_v59 }
 0xafe   :  { %v2579_v36 = vmax.f32 %v2575_v54, 0.0 }
 0xaff   :  { %v2578_v35 = vmax.f32 %v2570_v18, 0.0 }
 0xb01   :  { %3051 = vmatprep.mubr.msk.f32.mxu1 %vm2595_vm10, %v2578_v35 }
 0xb02   :  { %3052 = vmatmul.mubr.msk.f32.vlgmr.msra.gmra.mrb[32].mxu1 %vm2595_vm10, %v2579_v36 }
 0xb03   :  { %3151 = shalt.err (!%p3148_p4)
}
 0xb04   :  { %s3152_s22 = scalar_lea.hbm %s3816_s17, 1024 }
 0xb05   :  { %p3153_p5 = scmp.ne.s32.totalorder %s3816_s17, %s3152_s22  ;;  %p3156_p6 = scmp.lt.u32.totalorder %s3152_s22, %s3816_s17 }
 0xb07   :  { %p3158_p7 = pnand %p3156_p6, %p3153_p5 }
 0xb09   :  { %3161 = shalt.err (!%p3158_p7)
}
 0xb0a   :  { %s3195_s26 = smov 128   ;;  %s3196_s4 = smov 8   ;;  %v2774_v37 = vld [vmem:[%s3814_s15] ss:$0 sm:$0xff] }
 0xb0b   :  { %2704 = dma.vmem_to_hbm [thread:$0]  %s2699_s11, 1024, %s3816_s17, [#allocation5], %s3195_s26, %s3195_s26, %s3196_s4  }
 0xb0c   :  { %s3197_s0 = smov [#allocation2]  }
 0xb0d   :  { %s2686_s2 = sshll.u32 %s3197_s0, 4  ;;  %s2687_s2 = int_to_ptr.vmem [resolvable:$true] %s2686_s2 }
 0xb0e   :  { %s3162_s17 = scalar_lea.vmem %s2687_s2, 256  ;;  %p3167_p9 = scmp.lt.s32.totalorder %s2687_s2, %s2687_s2 }
 0xb0f   :  { %p3163_p8 = scmp.ne.s32.totalorder %s2687_s2, %s3162_s17  ;;  %p3168_p10 = scmp.lt.s32.totalorder %s3162_s17, %s3162_s17 }
 0xb11   :  { %p3169_p11 = por %p3168_p10, %p3167_p9 }
 0xb13   :  { %p3170_p12 = pnand %p3169_p11, %p3163_p8 }
 0xbd5   :  { %v3053_v17 = vpop.f32.mrb[32].mxu1 }
 0xbd6   :  { %v2674_v20 = vadd.f32 %v3053_v17, %v2774_v37  ;;  %v2668_v38 = vpop.f32.mrb[33].mxu1 }
 0xbd7   :  { %v2669_v39 = vadd.f32 %v2774_v37, %v2668_v38 }
 0xbd8   :  { %v2678_v40 = vadd.f32 %v2674_v20, %v3716_v63 }
 0xbd9   :  { %v2677_v41 = vadd.f32 %v2669_v39, %v3677_v22 }
 0xbda   :  { %2680 = vst.msk [vmem:[#allocation2 + $0x8] sm:$0xff] %vm61_vm0, %v2678_v40 }
 0xbdb   :  { %2679 = vst.msk [vmem:[#allocation2] sm:$0xff] %vm61_vm0, %v2677_v41 }
 0xbdc   :  { %3173 = shalt.err (!%p3170_p12)
}
 0xbdd   :  { %s3174_s30 = scalar_lea.hbm %s3815_s16, 256 }
 0xbde   :  { %p3175_p13 = scmp.ne.s32.totalorder %s3815_s16, %s3174_s30  ;;  %p3178_p0 = scmp.lt.u32.totalorder %s3174_s30, %s3815_s16 }
 0xbe0   :  { %p3180_p1 = pnand %p3178_p0, %p3175_p13 }
 0xbe2   :  { %3183 = shalt.err (!%p3180_p1)
}
 0xbe3   :  { %2692 = dma.vmem_to_hbm [thread:$0]  %s2687_s2, 256, %s3815_s16, [#allocation3], %s3195_s26, %s3195_s26, %s3196_s4  }
 0xbe4   :  { %3184 = dma.done.wait [#allocation3], 256  }
 0xbe5   :  { %3185 = vsyncadd [#allocation3], 4294967040 }
 0xbe6   :  { %3186 = dma.done.wait [#allocation5], 1024  }
 0xbe7   :  { %3187 = vsyncadd [#allocation5], 4294966272 }
 0xbe8   :  { %2711 = vsyncpa [#allocation3], 1 }
 0xbe9   :  { %2712 = vsyncpa [#allocation5], 1 }

</bundles_post_ra>
